<compile_context>
chip_gen: v6e
topology: v6e:2x2x1
jax: 0.10.0
libtpu: 0.0.40
codegen_flags: <defaults>
</compile_context>

<pallas_src>
import functools

import jax
import jax.numpy as jnp
import numpy as np
from jax.experimental import pallas as pl
from jax.experimental.pallas import tpu as pltpu  # noqa: F401  (kept for parity)


def _slab_layout(D, K):
    """Row offsets inside the f32 constants slab (8-row aligned blocks)."""
    row_b2 = 0                                    # b2                  (1, P*D)
    row_sq = 1                                    # ||E||^2 | ||e_mean||^2
    row_et = 8                                    # E^T blocks          (D, P*K)
    row_em = row_et + ((D + 7) // 8) * 8          # e_mean              (K, D)
    n_rows = row_em + ((K + 7) // 8) * 8
    return row_b2, row_sq, row_et, row_em, n_rows


def _vq_kernel(xaug_ref, w1_ref, w2_ref, c_ref, out_ref, *,
               dims, commitment_cost):
    Din, H, P, D, K = dims
    PD, PK = P * D, P * K
    B = xaug_ref.shape[0]
    row_b2, row_sq, row_et, row_em, _ = _slab_layout(D, K)

    xaug = xaug_ref[...]                              # (B, Din+1) f32, ones col
    x = xaug[:, :Din]                                 # (B, Din)

    # --- linear1 for all P dictionaries: ONE lane-dense matmul.  Bias row is
    # folded into W1; weights travel bf16 over HBM, upcast in VMEM -> f32 math.
    w1 = w1_ref[...].astype(jnp.float32)              # (Din+1, P*H)
    h = jnp.dot(xaug, w1, preferred_element_type=jnp.float32)
    h = jnp.maximum(h, 0.0)                           # (B, P*H)

    w2 = w2_ref[...].astype(jnp.float32)              # (H, P*D) dense
    b2 = c_ref[row_b2:row_b2 + 1, :PD]                # (1, P*D)
    esq = c_ref[row_sq:row_sq + 1, :PK]               # (1, P*K)  ||E[p,k]||^2
    ET = c_ref[row_et:row_et + D, :PK]                # (D, P*K)  E[p].T blocks

    # --- linear2 + distance table, statically unrolled over the P dictionaries.
    # dist_p[b,k] = ||z_p[b]||^2 + ||E[p,k]||^2 - 2 z_p[b].E[p,k]
    ave = jnp.zeros((B, K), jnp.float32)
    for p in range(P):
        hp = h[:, p * H:(p + 1) * H]                                  # (B, H)
        zp = (jnp.dot(hp, w2[:, p * D:(p + 1) * D],
                      preferred_element_type=jnp.float32)
              + b2[:, p * D:(p + 1) * D])                             # (B, D)
        zsq = jnp.sum(zp * zp, axis=1, keepdims=True)                 # (B, 1)
        cross = jnp.dot(zp, ET[:, p * K:(p + 1) * K],
                        preferred_element_type=jnp.float32)           # (B, K)
        dp = zsq + esq[:, p * K:(p + 1) * K] - 2.0 * cross            # (B, K)
        out_ref[:, p * K:(p + 1) * K] = dp          # distances slab slice
        ave = ave + dp
    ave = ave * (1.0 / P)

    # --- argmin over the averaged distances -> one-hot -> quantize with e_mean.
    iota_bk = jax.lax.broadcasted_iota(jnp.int32, (B, K), 1)
    min_val = jnp.min(ave, axis=1, keepdims=True)
    idx = jnp.min(jnp.where(ave == min_val, iota_bk, K),
                  axis=1, keepdims=True)                              # (B, 1)
    onehot = (iota_bk == idx).astype(jnp.float32)                     # (B, K)

    e_mean = c_ref[row_em:row_em + K, :D]                             # (K, D)
    vq = jnp.dot(onehot, e_mean, preferred_element_type=jnp.float32)  # (B, D)
    out_ref[:, PK:PK + D] = x + (vq - x)     # straight-through forward value

    # --- all_vq_loss[b, j] = (1 + cc) * ||e_mean[j] - x_b||^2  (vs raw input,
    # exactly like the PyTorch module), via the matmul identity on the MXU.
    x_sq = jnp.sum(x * x, axis=1, keepdims=True)                      # (B, 1)
    xe = jax.lax.dot_general(x, e_mean, (((1,), (1,)), ((), ())),
                             preferred_element_type=jnp.float32)      # (B, K)
    emsq = c_ref[row_sq:row_sq + 1, PK:PK + K]                        # (1, K)
    out_ref[:, PK + D:PK + D + K] = (1.0 + commitment_cost) * (
        x_sq + emsq - 2.0 * xe)

    # Zero the pad lanes so the whole lane-dense slab is fully written.
    used = PK + D + K
    if used < out_ref.shape[1]:
        out_ref[:, used:] = jnp.zeros((B, out_ref.shape[1] - used), jnp.float32)


def pack_vq_params(W1, b1, W2, b2, E, weight_dtype=jnp.bfloat16):
    """One-time packing of the module weights (hoist out of the per-call path).

    Returns ((w1_aug_bf16, w2_dense_bf16, const_slab_f32, e_mean_f32), dims)."""
    P, Din, H = W1.shape
    K, D = E.shape[1], E.shape[2]
    assert W2.shape == (P, H, D) and b1.shape == (P, H) and b2.shape == (P, D)
    assert Din == D, "straight-through add / all_vq losses need input_dim == dict_dim"
    f32 = jnp.float32
    PD, PK = P * D, P * K

    # linear1 weights for all dictionaries, bias row folded in -> (Din+1, P*H).
    W1_all = jnp.transpose(W1, (1, 0, 2)).reshape(Din, P * H)
    w1_aug = jnp.concatenate([W1_all, b1.reshape(1, P * H)],
                             axis=0).astype(weight_dtype)
    # linear2 weights DENSE (no block-diagonal zero padding) -> (H, P*D).
    w2_dense = jnp.transpose(W2, (1, 0, 2)).reshape(H, PD).astype(weight_dtype)

    e_mean = jnp.mean(E.astype(f32), axis=0)                          # (K, D)

    # All remaining small constants go into ONE f32 slab (one input DMA).
    row_b2, row_sq, row_et, row_em, n_rows = _slab_layout(D, K)
    slab_w = 128 * max(1, -(-max(PD, PK + K, D) // 128))
    slab = jnp.zeros((n_rows, slab_w), f32)
    slab = slab.at[row_b2, :PD].set(b2.reshape(PD).astype(f32))
    slab = slab.at[row_sq, :PK].set(jnp.sum(E.astype(f32) ** 2, axis=2).reshape(PK))
    slab = slab.at[row_sq, PK:PK + K].set(jnp.sum(e_mean ** 2, axis=1))
    slab = slab.at[row_et:row_et + D, :PK].set(
        jnp.transpose(E.astype(f32), (2, 0, 1)).reshape(D, PK))
    slab = slab.at[row_em:row_em + K, :D].set(e_mean)

    dims = (int(Din), int(H), int(P), int(D), int(K))
    return (w1_aug, w2_dense, slab, e_mean), dims


@functools.partial(jax.jit, static_argnames=("dims", "commitment_cost"))
def vq_forward_packed(x, w1_aug, w2_dense, const_slab, *, dims,
                      commitment_cost=0.25):
    """Hot path: single-step Pallas kernel, returns (vq_z, dist_slab, loss_slab)."""
    Din, H, P, D, K = dims
    B = x.shape[0]
    used = P * K + D + K
    out_w = 128 * pl.cdiv(used, 128)                  # lane-dense output slab

    # Fold the linear1 bias into the matmul: append a ones column to x.
    x_aug = jnp.concatenate(
        [x.astype(jnp.float32), jnp.ones((B, 1), jnp.float32)], axis=1)

    kernel = functools.partial(_vq_kernel, dims=dims,
                               commitment_cost=commitment_cost)
    # Single invocation, whole operands resident in VMEM (~0.3 MiB of weights
    # after bf16 + dense W2): no grid -> no per-step pipeline overhead.
    out = pl.pallas_call(
        kernel,
        out_shape=jax.ShapeDtypeStruct((B, out_w), jnp.float32),
    )(x_aug, w1_aug, w2_dense, const_slab)

    dist_slab = out[:, :P * K]                        # (B, P*K)
    vq_z = out[:, P * K:P * K + D]                    # (B, D)
    loss_slab = out[:, P * K + D:P * K + D + K]       # (B, K)
    return vq_z, dist_slab, loss_slab


def vq_forward(x, packed, dims, label_gen, commitment_cost=0.25):
    """Module-API-compatible wrapper: returns (vq_z, distances[list P],
    all_vq_z[list K], all_vq_loss[list K], changed_vq_z).  The Python list
    building here is compatibility/test-only; use vq_forward_packed in a hot
    loop to avoid the ~36 tiny slice ops per call."""
    w1_aug, w2_dense, slab, e_mean = packed
    vq_z, dist_slab, loss_slab = vq_forward_packed(
        x, w1_aug, w2_dense, slab, dims=dims, commitment_cost=commitment_cost)
    _, _, P, D, K = dims
    distances = [dist_slab[:, i * K:(i + 1) * K] for i in range(P)]
    # all_vq_z[j] = input_z + (mean_i E[i][j] - input_z).detach()  (forward value)
    all_vq_z = [x + (e_mean[j][None, :] - x) for j in range(K)]
    all_vq_loss = [loss_slab[:, j] for j in range(K)]
    changed_vq_z = e_mean[label_gen]      # mean_i embedding[i].weight[label]
    return vq_z, distances, all_vq_z, all_vq_loss, changed_vq_z


def _reference(x, W1, b1, W2, b2, E, label_gen, commitment_cost=0.25):
    P, K = E.shape[0], E.shape[1]
    zs = [jnp.maximum(x @ W1[i] + b1[i], 0.0) @ W2[i] + b2[i] for i in range(P)]
    dists = [jnp.sum(z * z, 1, keepdims=True) + jnp.sum(E[i] * E[i], 1)[None, :]
             - 2.0 * z @ E[i].T for i, z in enumerate(zs)]
    ave = jnp.mean(jnp.stack(dists, 1), 1)
    idx = jnp.argmin(ave, 1)
    onehot = jax.nn.one_hot(idx, K, dtype=jnp.float32)
    vq = jnp.mean(jnp.stack([onehot @ E[i] for i in range(P)], 1), 1)
    vq = x + (vq - x)
    emean = jnp.mean(E, 0)
    all_vq_z = [x + (emean[j] - x) for j in range(K)]
    all_vq_loss = [jnp.sum((emean[j] - x) ** 2, 1) * (1.0 + commitment_cost)
                   for j in range(K)]
    changed = emean[label_gen]
    return vq, dists, all_vq_z, all_vq_loss, changed


if __name__ == "__main__":
    B = 8
    input_dim = 32          # must equal dict_dim for the straight-through add
    dict_dim = 32
    num_factor = 16
    per_factor_dict_size = 4
    hidden = 512            # hard-coded in the PyTorch module

    key = jax.random.PRNGKey(0)
    ks = jax.random.split(key, 8)
    x = jax.random.normal(ks[0], (B, input_dim), jnp.float32)
    lim1 = 1.0 / np.sqrt(input_dim)
    lim2 = 1.0 / np.sqrt(hidden)
    W1 = jax.random.uniform(ks[1], (per_factor_dict_size, input_dim, hidden),
                            jnp.float32, -lim1, lim1)
    b1 = jax.random.uniform(ks[2], (per_factor_dict_size, hidden),
                            jnp.float32, -lim1, lim1)
    W2 = jax.random.uniform(ks[3], (per_factor_dict_size, hidden, dict_dim),
                            jnp.float32, -lim2, lim2)
    b2 = jax.random.uniform(ks[4], (per_factor_dict_size, dict_dim),
                            jnp.float32, -lim2, lim2)
    E = jax.random.uniform(ks[5], (per_factor_dict_size, num_factor, dict_dim),
                           jnp.float32, -1.0 / num_factor, 1.0 / num_factor)
    label_gen = jax.random.randint(ks[6], (B,), 0, num_factor, jnp.int32)

    # One-time weight packing (hoisted out of the per-call path).
    packed, dims = pack_vq_params(W1, b1, W2, b2, E)

    outs = vq_forward(x, packed, dims, label_gen)
    jax.block_until_ready(outs)

    vqz, dists, all_vq_z, all_vq_loss, changed = outs

    # The kernel stores the encoder weights (W1, b1, W2) as bf16 by design;
    # the reference uses the same quantized weights so the argmin decision and
    # distance tables are compared against identical stored parameters.  The
    # codebooks, b2 and the whole epilogue stay f32 in both.
    q = lambda a: a.astype(jnp.bfloat16).astype(jnp.float32)
    r_vqz, r_dists, r_avz, r_avl, r_changed = _reference(
        x, q(W1), q(b1), q(W2), b2, E, label_gen)

    np.testing.assert_allclose(np.asarray(vqz), np.asarray(r_vqz),
                               rtol=1e-2, atol=1e-2)
    for a, b_ in zip(dists, r_dists):
        np.testing.assert_allclose(np.asarray(a), np.asarray(b_),
                                   rtol=1e-2, atol=1e-2)
    for a, b_ in zip(all_vq_loss, r_avl):
        np.testing.assert_allclose(np.asarray(a), np.asarray(b_),
                                   rtol=1e-2, atol=1e-2)
    for a, b_ in zip(all_vq_z, r_avz):
        np.testing.assert_allclose(np.asarray(a), np.asarray(b_),
                                   rtol=1e-2, atol=1e-2)
    np.testing.assert_allclose(np.asarray(changed), np.asarray(r_changed),
                               rtol=1e-2, atol=1e-2)

    print("KERNEL_OK")
</pallas_src>

<mosaic_0001>
module attributes {stable_mosaic.version = 11 : i64} {
  func.func @_vq_kernel(%arg0: memref<8x33xf32, #tpu.memory_space<vmem>>, %arg1: memref<33x2048xbf16, #tpu.memory_space<vmem>>, %arg2: memref<512x128xbf16, #tpu.memory_space<vmem>>, %arg3: memref<56x128xf32, #tpu.memory_space<vmem>>, %arg4: memref<8x128xf32, #tpu.memory_space<vmem>>) attributes {dimension_semantics = [], scalar_prefetch = 0 : i64, scratch_operands = 0 : i64, tpu.core_type = #tpu.core_type<tc>} {
    %c0 = arith.constant 0 : index
    %c0_0 = arith.constant 0 : index
    %0 = vector.load %arg0[%c0, %c0_0] : memref<8x33xf32, #tpu.memory_space<vmem>>, vector<8x33xf32>
    %1 = vector.extract_strided_slice %0 {offsets = [0, 0], sizes = [8, 32], strides = [1, 1]} : vector<8x33xf32> to vector<8x32xf32>
    %c0_1 = arith.constant 0 : index
    %c0_2 = arith.constant 0 : index
    %2 = vector.load %arg1[%c0_1, %c0_2] : memref<33x2048xbf16, #tpu.memory_space<vmem>>, vector<33x2048xbf16>
    %3 = arith.extf %2 : vector<33x2048xbf16> to vector<33x2048xf32>
    %cst = arith.constant dense<0.000000e+00> : vector<8x2048xf32>
    %4 = tpu.matmul %0, %3, %cst {dimension_numbers = #tpu.dot_dimension_numbers<[1], [0], [0], [1], [0, 0, 1, 1], [], []>} : vector<8x33xf32>, vector<33x2048xf32>, vector<8x2048xf32> -> vector<8x2048xf32>
    %cst_3 = arith.constant 0.000000e+00 : f32
    %5 = vector.broadcast %cst_3 : f32 to vector<8x2048xf32>
    %6 = arith.maximumf %4, %5 : vector<8x2048xf32>
    %c0_4 = arith.constant 0 : index
    %c0_5 = arith.constant 0 : index
    %7 = vector.load %arg2[%c0_4, %c0_5] : memref<512x128xbf16, #tpu.memory_space<vmem>>, vector<512x128xbf16>
    %8 = arith.extf %7 : vector<512x128xbf16> to vector<512x128xf32>
    %c0_6 = arith.constant 0 : index
    %c0_7 = arith.constant 0 : index
    %9 = vector.load %arg3[%c0_6, %c0_7] : memref<56x128xf32, #tpu.memory_space<vmem>>, vector<1x128xf32>
    %c1 = arith.constant 1 : index
    %c0_8 = arith.constant 0 : index
    %10 = vector.load %arg3[%c1, %c0_8] : memref<56x128xf32, #tpu.memory_space<vmem>>, vector<1x64xf32>
    %c8 = arith.constant 8 : index
    %c0_9 = arith.constant 0 : index
    %11 = vector.load %arg3[%c8, %c0_9] : memref<56x128xf32, #tpu.memory_space<vmem>>, vector<32x64xf32>
    %cst_10 = arith.constant 0.000000e+00 : f32
    %12 = vector.broadcast %cst_10 : f32 to vector<8x16xf32>
    %13 = vector.extract_strided_slice %6 {offsets = [0, 0], sizes = [8, 512], strides = [1, 1]} : vector<8x2048xf32> to vector<8x512xf32>
    %14 = vector.extract_strided_slice %8 {offsets = [0, 0], sizes = [512, 32], strides = [1, 1]} : vector<512x128xf32> to vector<512x32xf32>
    %cst_11 = arith.constant dense<0.000000e+00> : vector<8x32xf32>
    %15 = tpu.matmul %13, %14, %cst_11 {dimension_numbers = #tpu.dot_dimension_numbers<[1], [0], [0], [1], [0, 0, 1, 1], [], []>} : vector<8x512xf32>, vector<512x32xf32>, vector<8x32xf32> -> vector<8x32xf32>
    %16 = vector.extract_strided_slice %9 {offsets = [0, 0], sizes = [1, 32], strides = [1, 1]} : vector<1x128xf32> to vector<1x32xf32>
    %17 = vector.broadcast %16 : vector<1x32xf32> to vector<8x32xf32>
    %18 = arith.addf %15, %17 : vector<8x32xf32>
    %19 = arith.mulf %18, %18 : vector<8x32xf32>
    %cst_12 = arith.constant dense<0.000000e+00> : vector<8xf32>
    %20 = vector.multi_reduction <add>, %19, %cst_12 [1] : vector<8x32xf32> to vector<8xf32>
    %21 = vector.shape_cast %20 : vector<8xf32> to vector<8x1xf32>
    %22 = vector.extract_strided_slice %11 {offsets = [0, 0], sizes = [32, 16], strides = [1, 1]} : vector<32x64xf32> to vector<32x16xf32>
    %cst_13 = arith.constant dense<0.000000e+00> : vector<8x16xf32>
    %23 = tpu.matmul %18, %22, %cst_13 {dimension_numbers = #tpu.dot_dimension_numbers<[1], [0], [0], [1], [0, 0, 1, 1], [], []>} : vector<8x32xf32>, vector<32x16xf32>, vector<8x16xf32> -> vector<8x16xf32>
    %24 = vector.extract_strided_slice %10 {offsets = [0, 0], sizes = [1, 16], strides = [1, 1]} : vector<1x64xf32> to vector<1x16xf32>
    %25 = vector.broadcast %21 : vector<8x1xf32> to vector<8x16xf32>
    %26 = vector.broadcast %24 : vector<1x16xf32> to vector<8x16xf32>
    %27 = arith.addf %25, %26 : vector<8x16xf32>
    %cst_14 = arith.constant 2.000000e+00 : f32
    %28 = vector.broadcast %cst_14 : f32 to vector<8x16xf32>
    %29 = arith.mulf %28, %23 : vector<8x16xf32>
    %30 = arith.subf %27, %29 : vector<8x16xf32>
    %c0_15 = arith.constant 0 : index
    %c0_16 = arith.constant 0 : index
    %31 = vector.load %arg4[%c0_15, %c0_16] : memref<8x128xf32, #tpu.memory_space<vmem>>, vector<8x16xf32>
    tpu.vector_store %arg4[%c0_15, %c0_16], %30 {strides = array<i32>} : memref<8x128xf32, #tpu.memory_space<vmem>>, vector<8x16xf32>,
    %32 = arith.addf %12, %30 : vector<8x16xf32>
    %33 = vector.extract_strided_slice %6 {offsets = [0, 512], sizes = [8, 512], strides = [1, 1]} : vector<8x2048xf32> to vector<8x512xf32>
    %34 = vector.extract_strided_slice %8 {offsets = [0, 32], sizes = [512, 32], strides = [1, 1]} : vector<512x128xf32> to vector<512x32xf32>
    %cst_17 = arith.constant dense<0.000000e+00> : vector<8x32xf32>
    %35 = tpu.matmul %33, %34, %cst_17 {dimension_numbers = #tpu.dot_dimension_numbers<[1], [0], [0], [1], [0, 0, 1, 1], [], []>} : vector<8x512xf32>, vector<512x32xf32>, vector<8x32xf32> -> vector<8x32xf32>
    %36 = vector.extract_strided_slice %9 {offsets = [0, 32], sizes = [1, 32], strides = [1, 1]} : vector<1x128xf32> to vector<1x32xf32>
    %37 = vector.broadcast %36 : vector<1x32xf32> to vector<8x32xf32>
    %38 = arith.addf %35, %37 : vector<8x32xf32>
    %39 = arith.mulf %38, %38 : vector<8x32xf32>
    %cst_18 = arith.constant dense<0.000000e+00> : vector<8xf32>
    %40 = vector.multi_reduction <add>, %39, %cst_18 [1] : vector<8x32xf32> to vector<8xf32>
    %41 = vector.shape_cast %40 : vector<8xf32> to vector<8x1xf32>
    %42 = vector.extract_strided_slice %11 {offsets = [0, 16], sizes = [32, 16], strides = [1, 1]} : vector<32x64xf32> to vector<32x16xf32>
    %cst_19 = arith.constant dense<0.000000e+00> : vector<8x16xf32>
    %43 = tpu.matmul %38, %42, %cst_19 {dimension_numbers = #tpu.dot_dimension_numbers<[1], [0], [0], [1], [0, 0, 1, 1], [], []>} : vector<8x32xf32>, vector<32x16xf32>, vector<8x16xf32> -> vector<8x16xf32>
    %44 = vector.extract_strided_slice %10 {offsets = [0, 16], sizes = [1, 16], strides = [1, 1]} : vector<1x64xf32> to vector<1x16xf32>
    %45 = vector.broadcast %41 : vector<8x1xf32> to vector<8x16xf32>
    %46 = vector.broadcast %44 : vector<1x16xf32> to vector<8x16xf32>
    %47 = arith.addf %45, %46 : vector<8x16xf32>
    %cst_20 = arith.constant 2.000000e+00 : f32
    %48 = vector.broadcast %cst_20 : f32 to vector<8x16xf32>
    %49 = arith.mulf %48, %43 : vector<8x16xf32>
    %50 = arith.subf %47, %49 : vector<8x16xf32>
    %c0_21 = arith.constant 0 : index
    %c16 = arith.constant 16 : index
    %51 = vector.load %arg4[%c0_21, %c16] : memref<8x128xf32, #tpu.memory_space<vmem>>, vector<8x16xf32>
    tpu.vector_store %arg4[%c0_21, %c16], %50 {strides = array<i32>} : memref<8x128xf32, #tpu.memory_space<vmem>>, vector<8x16xf32>,
    %52 = arith.addf %32, %50 : vector<8x16xf32>
    %53 = vector.extract_strided_slice %6 {offsets = [0, 1024], sizes = [8, 512], strides = [1, 1]} : vector<8x2048xf32> to vector<8x512xf32>
    %54 = vector.extract_strided_slice %8 {offsets = [0, 64], sizes = [512, 32], strides = [1, 1]} : vector<512x128xf32> to vector<512x32xf32>
    %cst_22 = arith.constant dense<0.000000e+00> : vector<8x32xf32>
    %55 = tpu.matmul %53, %54, %cst_22 {dimension_numbers = #tpu.dot_dimension_numbers<[1], [0], [0], [1], [0, 0, 1, 1], [], []>} : vector<8x512xf32>, vector<512x32xf32>, vector<8x32xf32> -> vector<8x32xf32>
    %56 = vector.extract_strided_slice %9 {offsets = [0, 64], sizes = [1, 32], strides = [1, 1]} : vector<1x128xf32> to vector<1x32xf32>
    %57 = vector.broadcast %56 : vector<1x32xf32> to vector<8x32xf32>
    %58 = arith.addf %55, %57 : vector<8x32xf32>
    %59 = arith.mulf %58, %58 : vector<8x32xf32>
    %cst_23 = arith.constant dense<0.000000e+00> : vector<8xf32>
    %60 = vector.multi_reduction <add>, %59, %cst_23 [1] : vector<8x32xf32> to vector<8xf32>
    %61 = vector.shape_cast %60 : vector<8xf32> to vector<8x1xf32>
    %62 = vector.extract_strided_slice %11 {offsets = [0, 32], sizes = [32, 16], strides = [1, 1]} : vector<32x64xf32> to vector<32x16xf32>
    %cst_24 = arith.constant dense<0.000000e+00> : vector<8x16xf32>
    %63 = tpu.matmul %58, %62, %cst_24 {dimension_numbers = #tpu.dot_dimension_numbers<[1], [0], [0], [1], [0, 0, 1, 1], [], []>} : vector<8x32xf32>, vector<32x16xf32>, vector<8x16xf32> -> vector<8x16xf32>
    %64 = vector.extract_strided_slice %10 {offsets = [0, 32], sizes = [1, 16], strides = [1, 1]} : vector<1x64xf32> to vector<1x16xf32>
    %65 = vector.broadcast %61 : vector<8x1xf32> to vector<8x16xf32>
    %66 = vector.broadcast %64 : vector<1x16xf32> to vector<8x16xf32>
    %67 = arith.addf %65, %66 : vector<8x16xf32>
    %cst_25 = arith.constant 2.000000e+00 : f32
    %68 = vector.broadcast %cst_25 : f32 to vector<8x16xf32>
    %69 = arith.mulf %68, %63 : vector<8x16xf32>
    %70 = arith.subf %67, %69 : vector<8x16xf32>
    %c0_26 = arith.constant 0 : index
    %c32 = arith.constant 32 : index
    %71 = vector.load %arg4[%c0_26, %c32] : memref<8x128xf32, #tpu.memory_space<vmem>>, vector<8x16xf32>
    tpu.vector_store %arg4[%c0_26, %c32], %70 {strides = array<i32>} : memref<8x128xf32, #tpu.memory_space<vmem>>, vector<8x16xf32>,
    %72 = arith.addf %52, %70 : vector<8x16xf32>
    %73 = vector.extract_strided_slice %6 {offsets = [0, 1536], sizes = [8, 512], strides = [1, 1]} : vector<8x2048xf32> to vector<8x512xf32>
    %74 = vector.extract_strided_slice %8 {offsets = [0, 96], sizes = [512, 32], strides = [1, 1]} : vector<512x128xf32> to vector<512x32xf32>
    %cst_27 = arith.constant dense<0.000000e+00> : vector<8x32xf32>
    %75 = tpu.matmul %73, %74, %cst_27 {dimension_numbers = #tpu.dot_dimension_numbers<[1], [0], [0], [1], [0, 0, 1, 1], [], []>} : vector<8x512xf32>, vector<512x32xf32>, vector<8x32xf32> -> vector<8x32xf32>
    %76 = vector.extract_strided_slice %9 {offsets = [0, 96], sizes = [1, 32], strides = [1, 1]} : vector<1x128xf32> to vector<1x32xf32>
    %77 = vector.broadcast %76 : vector<1x32xf32> to vector<8x32xf32>
    %78 = arith.addf %75, %77 : vector<8x32xf32>
    %79 = arith.mulf %78, %78 : vector<8x32xf32>
    %cst_28 = arith.constant dense<0.000000e+00> : vector<8xf32>
    %80 = vector.multi_reduction <add>, %79, %cst_28 [1] : vector<8x32xf32> to vector<8xf32>
    %81 = vector.shape_cast %80 : vector<8xf32> to vector<8x1xf32>
    %82 = vector.extract_strided_slice %11 {offsets = [0, 48], sizes = [32, 16], strides = [1, 1]} : vector<32x64xf32> to vector<32x16xf32>
    %cst_29 = arith.constant dense<0.000000e+00> : vector<8x16xf32>
    %83 = tpu.matmul %78, %82, %cst_29 {dimension_numbers = #tpu.dot_dimension_numbers<[1], [0], [0], [1], [0, 0, 1, 1], [], []>} : vector<8x32xf32>, vector<32x16xf32>, vector<8x16xf32> -> vector<8x16xf32>
    %84 = vector.extract_strided_slice %10 {offsets = [0, 48], sizes = [1, 16], strides = [1, 1]} : vector<1x64xf32> to vector<1x16xf32>
    %85 = vector.broadcast %81 : vector<8x1xf32> to vector<8x16xf32>
    %86 = vector.broadcast %84 : vector<1x16xf32> to vector<8x16xf32>
    %87 = arith.addf %85, %86 : vector<8x16xf32>
    %cst_30 = arith.constant 2.000000e+00 : f32
    %88 = vector.broadcast %cst_30 : f32 to vector<8x16xf32>
    %89 = arith.mulf %88, %83 : vector<8x16xf32>
    %90 = arith.subf %87, %89 : vector<8x16xf32>
    %c0_31 = arith.constant 0 : index
    %c48 = arith.constant 48 : index
    %91 = vector.load %arg4[%c0_31, %c48] : memref<8x128xf32, #tpu.memory_space<vmem>>, vector<8x16xf32>
    tpu.vector_store %arg4[%c0_31, %c48], %90 {strides = array<i32>} : memref<8x128xf32, #tpu.memory_space<vmem>>, vector<8x16xf32>,
    %92 = arith.addf %72, %90 : vector<8x16xf32>
    %cst_32 = arith.constant 2.500000e-01 : f32
    %93 = vector.broadcast %cst_32 : f32 to vector<8x16xf32>
    %94 = arith.mulf %92, %93 : vector<8x16xf32>
    %95 = tpu.iota {dimensions = array<i32: 1>} : vector<8x16xi32>
    %cst_33 = arith.constant dense<0x7F800000> : vector<8xf32>
    %96 = vector.multi_reduction <minimumf>, %94, %cst_33 [1] : vector<8x16xf32> to vector<8xf32>
    %97 = vector.shape_cast %96 : vector<8xf32> to vector<8x1xf32>
    %98 = vector.broadcast %97 : vector<8x1xf32> to vector<8x16xf32>
    %99 = arith.cmpf oeq, %94, %98 : vector<8x16xf32>
    %c16_i32 = arith.constant 16 : i32
    %100 = vector.broadcast %c16_i32 : i32 to vector<8x16xi32>
    %101 = arith.select %99, %95, %100 : vector<8x16xi1>, vector<8x16xi32>
    %cst_34 = arith.constant dense<2147483647> : vector<8xi32>
    %102 = vector.multi_reduction <minsi>, %101, %cst_34 [1] : vector<8x16xi32> to vector<8xi32>
    %103 = vector.shape_cast %102 : vector<8xi32> to vector<8x1xi32>
    %104 = vector.broadcast %103 : vector<8x1xi32> to vector<8x16xi32>
    %105 = arith.cmpi eq, %95, %104 : vector<8x16xi32>
    %106 = arith.extui %105 : vector<8x16xi1> to vector<8x16xi32>
    %107 = arith.sitofp %106 : vector<8x16xi32> to vector<8x16xf32>
    %c40 = arith.constant 40 : index
    %c0_35 = arith.constant 0 : index
    %108 = vector.load %arg3[%c40, %c0_35] : memref<56x128xf32, #tpu.memory_space<vmem>>, vector<16x32xf32>
    %cst_36 = arith.constant dense<0.000000e+00> : vector<8x32xf32>
    %109 = tpu.matmul %107, %108, %cst_36 {dimension_numbers = #tpu.dot_dimension_numbers<[1], [0], [0], [1], [0, 0, 1, 1], [], []>} : vector<8x16xf32>, vector<16x32xf32>, vector<8x32xf32> -> vector<8x32xf32>
    %110 = arith.subf %109, %1 : vector<8x32xf32>
    %111 = arith.addf %1, %110 : vector<8x32xf32>
    %c0_37 = arith.constant 0 : index
    %c64 = arith.constant 64 : index
    %112 = vector.load %arg4[%c0_37, %c64] : memref<8x128xf32, #tpu.memory_space<vmem>>, vector<8x32xf32>
    tpu.vector_store %arg4[%c0_37, %c64], %111 {strides = array<i32>} : memref<8x128xf32, #tpu.memory_space<vmem>>, vector<8x32xf32>,
    %113 = arith.mulf %1, %1 : vector<8x32xf32>
    %cst_38 = arith.constant dense<0.000000e+00> : vector<8xf32>
    %114 = vector.multi_reduction <add>, %113, %cst_38 [1] : vector<8x32xf32> to vector<8xf32>
    %115 = vector.shape_cast %114 : vector<8xf32> to vector<8x1xf32>
    %cst_39 = arith.constant dense<0.000000e+00> : vector<8x16xf32>
    %116 = tpu.matmul %1, %108, %cst_39 {dimension_numbers = #tpu.dot_dimension_numbers<[1], [1], [0], [0], [0, 0, 1, 0], [], []>} : vector<8x32xf32>, vector<16x32xf32>, vector<8x16xf32> -> vector<8x16xf32>
    %c1_40 = arith.constant 1 : index
    %c64_41 = arith.constant 64 : index
    %117 = vector.load %arg3[%c1_40, %c64_41] : memref<56x128xf32, #tpu.memory_space<vmem>>, vector<1x16xf32>
    %118 = vector.broadcast %115 : vector<8x1xf32> to vector<8x16xf32>
    %119 = vector.broadcast %117 : vector<1x16xf32> to vector<8x16xf32>
    %120 = arith.addf %118, %119 : vector<8x16xf32>
    %cst_42 = arith.constant 2.000000e+00 : f32
    %121 = vector.broadcast %cst_42 : f32 to vector<8x16xf32>
    %122 = arith.mulf %121, %116 : vector<8x16xf32>
    %123 = arith.subf %120, %122 : vector<8x16xf32>
    %cst_43 = arith.constant 1.250000e+00 : f32
    %124 = vector.broadcast %cst_43 : f32 to vector<8x16xf32>
    %125 = arith.mulf %124, %123 : vector<8x16xf32>
    %c0_44 = arith.constant 0 : index
    %c96 = arith.constant 96 : index
    %126 = vector.load %arg4[%c0_44, %c96] : memref<8x128xf32, #tpu.memory_space<vmem>>, vector<8x16xf32>
    tpu.vector_store %arg4[%c0_44, %c96], %125 {strides = array<i32>} : memref<8x128xf32, #tpu.memory_space<vmem>>, vector<8x16xf32>,
    %cst_45 = arith.constant 0.000000e+00 : f32
    %127 = vector.broadcast %cst_45 : f32 to vector<8x16xf32>
    %c0_46 = arith.constant 0 : index
    %c112 = arith.constant 112 : index
    %128 = vector.load %arg4[%c0_46, %c112] : memref<8x128xf32, #tpu.memory_space<vmem>>, vector<8x16xf32>
    tpu.vector_store %arg4[%c0_46, %c112], %127 {strides = array<i32>} : memref<8x128xf32, #tpu.memory_space<vmem>>, vector<8x16xf32>,
    return
  }
}

</mosaic_0001>

<bundles_post_ra>
// kernel: vq_forward_packed.1
= control target key start
LH: loop header
LB: loop body
LE: loop exit
PB: predicated region body
PF: predicated region fallthrough
CT: control target
= control target key end

     0   :  { %9 = vsyncpa [#allocation3], 0  ;;  %s4985_s0 = inlined_call_operand.vmem [shape: f32[8,33], index: 0, kind: input, shape index: {}]   ;;  %s4986_s1 = inlined_call_operand.hbm [shape: bf16[33,2048], index: 1, kind: input, shape index: {}]   ;;  %s4987_s2 = inlined_call_operand.hbm [shape: bf16[512,128], index: 2, kind: input, shape index: {}]   ;;  %s4988_s3 = inlined_call_operand.hbm [shape: f32[56,128], index: 3, kind: input, shape index: {}]   ;;  %s4989_s4 = inlined_call_operand.vmem [shape: f32[8,128], index: 4, kind: output, shape index: {}]  }
   0x1   :  { %10 = vsyncpa [#allocation5], 0  ;;  %s3903_s15 = smov [#allocation4]  }
   0x2   :  { %s30_s16 = sshll.u32 %s3903_s15, 4  ;;  %s31_s16 = int_to_ptr.vmem [resolvable:$true] %s30_s16 }
   0x3   :  { %s3847_s17 = scalar_lea.vmem %s31_s16, 4096  ;;  %p3852_p1 = scmp.lt.s32.totalorder %s31_s16, %s31_s16 }
   0x4   :  { %p3848_p0 = scmp.ne.s32.totalorder %s31_s16, %s3847_s17  ;;  %p3853_p2 = scmp.lt.s32.totalorder %s3847_s17, %s3847_s17 }
   0x6   :  { %p3854_p3 = por %p3853_p2, %p3852_p1 }
   0x8   :  { %p3855_p4 = pnand %p3854_p3, %p3848_p0 }
   0xa   :  { %3858 = shalt.err (!%p3855_p4)
}
   0xb   :  { %s3904_s18 = smov 64   ;;  %s3905_s19 = smov 4  }
   0xc   :  { %36 = dma.hbm_to_vmem [thread:$0]  %s4987_s2, 4096, %s31_s16, [#allocation5], %s3904_s18, %s3904_s18, %s3905_s19  }
   0xd   :  { %s3906_s22 = smov [#allocation2]  }
   0xe   :  { %s18_s23 = sshll.u32 %s3906_s22, 4  ;;  %s19_s23 = int_to_ptr.vmem [resolvable:$true] %s18_s23 }
   0xf   :  { %s3867_s24 = scalar_lea.vmem %s19_s23, 5120  ;;  %p3872_p6 = scmp.lt.s32.totalorder %s19_s23, %s19_s23 }
  0x10   :  { %p3868_p5 = scmp.ne.s32.totalorder %s19_s23, %s3867_s24  ;;  %p3873_p7 = scmp.lt.s32.totalorder %s3867_s24, %s3867_s24 }
  0x12   :  { %p3874_p8 = por %p3873_p7, %p3872_p6 }
  0x14   :  { %p3875_p9 = pnand %p3874_p8, %p3868_p5 }
  0x16   :  { %3878 = shalt.err (!%p3875_p9)
}
  0x17   :  { %s3907_s25 = smov 1024   ;;  %s3908_s28 = smov [#allocation6]  }
  0x18   :  { %24 = dma.hbm_to_vmem [thread:$0]  %s4986_s1, 5120, %s19_s23, [#allocation3], %s3907_s25, %s3907_s25, %s3904_s18  }
  0x19   :  { %s42_s29 = sshll.u32 %s3908_s28, 4  ;;  %s43_s29 = int_to_ptr.vmem [resolvable:$true] %s42_s29 }
  0x1a   :  { %s3887_s2 = scalar_lea.vmem %s43_s29, 896  ;;  %p3892_p11 = scmp.lt.s32.totalorder %s43_s29, %s43_s29 }
  0x1b   :  { %p3888_p10 = scmp.ne.s32.totalorder %s43_s29, %s3887_s2  ;;  %p3893_p12 = scmp.lt.s32.totalorder %s3887_s2, %s3887_s2 }
  0x1d   :  { %p3894_p13 = por %p3893_p12, %p3892_p11 }
  0x1f   :  { %p3895_p0 = pnand %p3894_p13, %p3888_p10 }
  0x21   :  { %3898 = shalt.err (!%p3895_p0)
}
  0x22   :  { %s3909_s30 = smov 128   ;;  %s3910_s5 = smov 8  }
  0x23   :  { %48 = dma.hbm_to_vmem [thread:$0]  %s4988_s3, 896, %s43_s29, [#allocation5], %s3909_s30, %s3909_s30, %s3910_s5  }
  0x24   :  { %3899 = dma.done.wait [#allocation3], 5120  }
  0x25   :  { %3900 = vsyncadd [#allocation3], 4294962176 }
  0x26   :  { %3901 = dma.done.wait [#allocation5], 4992  }
  0x27   :  { %3902 = vsyncadd [#allocation5], 4294962304  ;;  %v4990_v0 = vmov 0.0   ;;  %v91_v1 = vld [vmem:[#allocation2 + $0x100] sm:$0x11]  ;;  %vm183_vm0 = vcmask 1040384  }
  0x28   :  { %296 = vmatprep.mubr.f32.mxu0 %v4990_v0  ;;  %367 = vmatprep.mubr.f32.mxu1 %v4990_v0  ;;  %v92_v2 = vld [vmem:[#allocation2 + $0x108] sm:$0x11]  ;;  %v83_v3 = vld [vmem:[#allocation2 + $0xc0] sm:$0xff]  ;;  %v163_v4 = vunpack.c.l.bf16 %v91_v1  ;;  %v164_v5 = vunpack.c.h.bf16 %v91_v1  ;;  %v93_v29 = vld [vmem:[#allocation2 + $0x110] sm:$0x11]  ;;  %vm179_vm1 = vcmask 269312  }
  0x29   :  { %v165_v6 = vunpack.c.l.bf16 %v92_v2  ;;  %v166_v7 = vunpack.c.h.bf16 %v92_v2  ;;  %v84_v8 = vld [vmem:[#allocation2 + $0xc8] sm:$0xff]  ;;  %v75_v9 = vld [vmem:[#allocation2 + $0x80] sm:$0xff]  ;;  %v148_v11 = vunpack.c.h.bf16 %v83_v3  ;;  %v147_v13 = vunpack.c.l.bf16 %v83_v3  ;;  %v94_v30 = vld [vmem:[#allocation2 + $0x118] sm:$0x11]  ;;  %s3912_s8 = smov 96   ;;  %s3913_s9 = smov 112  }
  0x2a   :  { %v76_v10 = vld [vmem:[#allocation2 + $0x88] sm:$0xff]  ;;  %v150_v12 = vunpack.c.h.bf16 %v84_v8  ;;  %v149_v14 = vunpack.c.l.bf16 %v84_v8  ;;  %v67_v15 = vld [vmem:[#allocation2 + $0x40] sm:$0xff]  ;;  %2783 = vmatprep.subr.msk.mxu0 %vm183_vm0, %v164_v5  ;;  %v132_v17 = vunpack.c.h.bf16 %v75_v9  ;;  %v131_v19 = vunpack.c.l.bf16 %v75_v9  ;;  %v85_v33 = vld [vmem:[#allocation2 + $0xd0] sm:$0xff]  ;;  %s3915_s10 = smov 32   ;;  %s3916_s11 = smov 80  }
  0x2b   :  { %v68_v16 = vld [vmem:[#allocation2 + $0x48] sm:$0xff]  ;;  %2786 = vmatprep.subr.msk.mxu1 %vm183_vm0, %v166_v7  ;;  %v134_v18 = vunpack.c.h.bf16 %v76_v10  ;;  %2784 = vmatpush1.msk.msra.mxu0 %vm183_vm0, %v163_v4  ;;  %v133_v20 = vunpack.c.l.bf16 %v76_v10  ;;  %v59_v21 = vld [vmem:[#allocation2] sm:$0xff]  ;;  %v116_v23 = vunpack.c.h.bf16 %v67_v15  ;;  %v115_v25 = vunpack.c.l.bf16 %v67_v15  ;;  %v86_v34 = vld [vmem:[#allocation2 + $0xd8] sm:$0xff]  ;;  %s3917_s12 = smov 16   ;;  %s3918_s13 = smov 48  }
  0x2c   :  { %2787 = vmatpush1.msk.msra.mxu1 %vm183_vm0, %v165_v6  ;;  %v60_v22 = vld [vmem:[#allocation2 + $0x8] sm:$0xff]  ;;  %256 = vmatprep.subr.mxu0 %v148_v11  ;;  %v118_v24 = vunpack.c.h.bf16 %v68_v16  ;;  %v117_v26 = vunpack.c.l.bf16 %v68_v16  ;;  %v100_v27 = vunpack.c.h.bf16 %v59_v21  ;;  %v99_v31 = vunpack.c.l.bf16 %v59_v21  ;;  %v3965_v35 = vld [vmem:[%s4985_s0] sm:$0xff]  ;;  %v77_v39 = vld [vmem:[#allocation2 + $0x90] sm:$0xff] }
  0x2d   :  { %327 = vmatprep.subr.mxu1 %v150_v12  ;;  %257 = vmatpush1.msra.mxu0 %v147_v13  ;;  %v102_v28 = vunpack.c.h.bf16 %v60_v22  ;;  %v101_v32 = vunpack.c.l.bf16 %v60_v22  ;;  %v168_v36 = vunpack.c.h.bf16 %v93_v29  ;;  %v170_v37 = vunpack.c.h.bf16 %v94_v30  ;;  %v78_v41 = vld [vmem:[#allocation2 + $0x98] sm:$0xff]  ;;  %v69_v45 = vld [vmem:[#allocation2 + $0x50] sm:$0xff]  ;;  %v95_v59 = vld [vmem:[#allocation2 + $0x120] sm:$0x11] }
  0x2e   :  { %328 = vmatpush1.msra.mxu1 %v149_v14  ;;  %258 = vmatprep.subr.mxu0 %v132_v17  ;;  %v167_v38 = vunpack.c.l.bf16 %v93_v29  ;;  %v169_v40 = vunpack.c.l.bf16 %v94_v30  ;;  %v152_v42 = vunpack.c.h.bf16 %v85_v33  ;;  %v154_v43 = vunpack.c.h.bf16 %v86_v34  ;;  %v70_v49 = vld [vmem:[#allocation2 + $0x58] sm:$0xff]  ;;  %v61_v51 = vld [vmem:[#allocation2 + $0x10] sm:$0xff]  ;;  %v96_v62 = vld [vmem:[#allocation2 + $0x128] sm:$0x11] }
  0x2f   :  { %329 = vmatprep.subr.mxu1 %v134_v18  ;;  %259 = vmatpush1.msra.mxu0 %v131_v19  ;;  %v151_v44 = vunpack.c.l.bf16 %v85_v33  ;;  %v153_v46 = vunpack.c.l.bf16 %v86_v34  ;;  %v136_v47 = vunpack.c.h.bf16 %v77_v39  ;;  %v138_v48 = vunpack.c.h.bf16 %v78_v41  ;;  %v62_v54 = vld [vmem:[#allocation2 + $0x18] sm:$0xff]  ;;  %v87_v1 = vld [vmem:[#allocation2 + $0xe0] sm:$0xff]  ;;  %v88_v5 = vld [vmem:[#allocation2 + $0xe8] sm:$0xff] }
  0x30   :  { %330 = vmatpush1.msra.mxu1 %v133_v20  ;;  %260 = vmatprep.subr.mxu0 %v116_v23  ;;  %v135_v50 = vunpack.c.l.bf16 %v77_v39  ;;  %v120_v52 = vunpack.c.h.bf16 %v69_v45  ;;  %v137_v53 = vunpack.c.l.bf16 %v78_v41  ;;  %v119_v55 = vunpack.c.l.bf16 %v69_v45  ;;  %v79_v6 = vld [vmem:[#allocation2 + $0xa0] sm:$0xff]  ;;  %v80_v10 = vld [vmem:[#allocation2 + $0xa8] sm:$0xff]  ;;  %v98_v29 = vld [vmem:[#allocation2 + $0x138] sm:$0x11] }
  0x31   :  { %331 = vmatprep.subr.mxu1 %v118_v24  ;;  %261 = vmatpush1.msra.mxu0 %v115_v25  ;;  %v122_v56 = vunpack.c.h.bf16 %v70_v49  ;;  %v104_v57 = vunpack.c.h.bf16 %v61_v51  ;;  %v121_v58 = vunpack.c.l.bf16 %v70_v49  ;;  %v103_v60 = vunpack.c.l.bf16 %v61_v51  ;;  %v71_v11 = vld [vmem:[#allocation2 + $0x60] sm:$0xff]  ;;  %v72_v16 = vld [vmem:[#allocation2 + $0x68] sm:$0xff]  ;;  %v3985_v33 = vld [vmem:[#allocation4 + $0x38] sm:$0xff]  }
  0x32   :  { %332 = vmatpush1.msra.mxu1 %v117_v26  ;;  %262 = vmatprep.subr.mxu0 %v100_v27  ;;  %v106_v61 = vunpack.c.h.bf16 %v62_v54  ;;  %v105_v63 = vunpack.c.l.bf16 %v62_v54  ;;  %v172_v2 = vunpack.c.h.bf16 %v95_v59  ;;  %v171_v3 = vunpack.c.l.bf16 %v95_v59  ;;  %v63_v17 = vld [vmem:[#allocation2 + $0x20] sm:$0xff]  ;;  %v64_v22 = vld [vmem:[#allocation2 + $0x28] sm:$0xff]  ;;  %v97_v27 = vld [vmem:[#allocation2 + $0x130] sm:$0x11] }
  0x33   :  { %333 = vmatprep.subr.mxu1 %v102_v28  ;;  %263 = vmatpush1.msra.mxu0 %v99_v31  ;;  %v174_v4 = vunpack.c.h.bf16 %v96_v62  ;;  %v156_v7 = vunpack.c.h.bf16 %v87_v1  ;;  %v173_v8 = vunpack.c.l.bf16 %v96_v62  ;;  %v155_v9 = vunpack.c.l.bf16 %v87_v1  ;;  %v89_v31 = vld [vmem:[#allocation2 + $0xf0] sm:$0xff]  ;;  %v3987_v34 = vld [vmem:[#allocation4 + $0x78] sm:$0xff]  }
  0x34   :  { %334 = vmatpush1.msra.mxu1 %v101_v32  ;;  %2785 = vmatmul.mubr.msk.f32.vlgmr.msra.gmra.mxu0 %vm179_vm1, %v3965_v35  ;;  %v158_v12 = vunpack.c.h.bf16 %v88_v5  ;;  %v140_v13 = vunpack.c.h.bf16 %v79_v6  ;;  %v157_v14 = vunpack.c.l.bf16 %v88_v5  ;;  %v139_v15 = vunpack.c.l.bf16 %v79_v6  ;;  %v81_v39 = vld [vmem:[#allocation2 + $0xb0] sm:$0xff]  ;;  %v3996_v49 = vld [vmem:[#allocation4 + $0xb8] sm:$0xff]  }
  0x35   :  { %2788 = vmatmul.mubr.msk.f32.vlgmr.msra.gmra.mxu1 %vm179_vm1, %v3965_v35  ;;  %2789 = vmatprep.subr.msk.mxu0 %vm183_vm0, %v168_v36  ;;  %v142_v18 = vunpack.c.h.bf16 %v80_v10  ;;  %v124_v19 = vunpack.c.h.bf16 %v71_v11  ;;  %v141_v20 = vunpack.c.l.bf16 %v80_v10  ;;  %v123_v21 = vunpack.c.l.bf16 %v71_v11  ;;  %v2960_v6 = vld [vmem:[#allocation4 + $0x70] sm:$0xff]  }
  0x36   :  { %2792 = vmatprep.subr.msk.mxu1 %vm183_vm0, %v170_v37  ;;  %2790 = vmatpush1.msk.msra.mxu0 %vm183_vm0, %v167_v38  ;;  %v126_v23 = vunpack.c.h.bf16 %v72_v16  ;;  %v108_v24 = vunpack.c.h.bf16 %v63_v17  ;;  %v125_v25 = vunpack.c.l.bf16 %v72_v16  ;;  %v107_v26 = vunpack.c.l.bf16 %v63_v17  ;;  %v90_v38 = vld [vmem:[#allocation2 + $0xf8] sm:$0xff]  ;;  %v2952_v10 = vld [vmem:[#allocation4 + $0x30] sm:$0xff]  }
  0x37   :  { %2793 = vmatpush1.msk.msra.mxu1 %vm183_vm0, %v169_v40  ;;  %398 = vmatprep.subr.mxu0 %v152_v42  ;;  %v110_v28 = vunpack.c.h.bf16 %v64_v22  ;;  %v109_v30 = vunpack.c.l.bf16 %v64_v22  ;;  %v176_v32 = vunpack.c.h.bf16 %v97_v27  ;;  %v175_v36 = vunpack.c.l.bf16 %v97_v27  ;;  %v2976_v16 = vld [vmem:[#allocation4 + $0xf0] sm:$0xff]   ;;  %v2951_v27 = vld [vmem:[#allocation4 + $0x28] sm:$0xff]  }
  0x38   :  { %469 = vmatprep.subr.mxu1 %v154_v43  ;;  %399 = vmatpush1.msra.mxu0 %v151_v44  ;;  %v178_v37 = vunpack.c.h.bf16 %v98_v29  ;;  %v160_v40 = vunpack.c.h.bf16 %v89_v31  ;;  %v177_v41 = vunpack.c.l.bf16 %v98_v29  ;;  %v159_v42 = vunpack.c.l.bf16 %v89_v31  ;;  %v82_v43 = vld [vmem:[#allocation2 + $0xb8] sm:$0xff]  ;;  %v73_v44 = vld [vmem:[#allocation2 + $0x70] sm:$0xff] }
  0x39   :  { %470 = vmatpush1.msra.mxu1 %v153_v46  ;;  %400 = vmatprep.subr.mxu0 %v136_v47  ;;  %v2850_v45 = vunpack.c.h.bf16 %v3985_v33  ;;  %v2882_v46 = vunpack.c.h.bf16 %v3987_v34  ;;  %v162_v47 = vunpack.c.h.bf16 %v90_v38  ;;  %v143_v51 = vunpack.c.l.bf16 %v81_v39 }
  0x3a   :  { %471 = vmatprep.subr.mxu1 %v138_v48  ;;  %401 = vmatpush1.msra.mxu0 %v135_v50  ;;  %v144_v48 = vunpack.c.h.bf16 %v81_v39  ;;  %v161_v50 = vunpack.c.l.bf16 %v90_v38  ;;  %v128_v54 = vunpack.c.h.bf16 %v73_v44  ;;  %v2849_v59 = vunpack.c.l.bf16 %v3985_v33 }
  0x3b   :  { %438 = vmatprep.mubr.f32.mxu0 %v4990_v0  ;;  %402 = vmatprep.subr.mxu0 %v120_v52  ;;  %v74_v52 = vld [vmem:[#allocation2 + $0x78] sm:$0xff]  ;;  %v2881_v1 = vunpack.c.l.bf16 %v3987_v34  ;;  %v2842_v33 = vunpack.c.h.bf16 %v2951_v27  ;;  %vm3914_vm2 = vmmov 0   ;;  %vm1095_vm3 = vcmask 261120  }
  0x3c   :  { %472 = vmatpush1.msra.mxu1 %v137_v53  ;;  %403 = vmatpush1.msra.mxu0 %v119_v55  ;;  %v146_v53 = vunpack.c.h.bf16 %v82_v43  ;;  %v65_v55 = vld [vmem:[#allocation2 + $0x30] sm:$0xff]  ;;  %v130_v62 = vunpack.c.h.bf16 %v74_v52  ;;  %vm1179_vm4 = vcmask 130048   ;;  %vm1682_vm5 = vcmask 261248  }
  0x3d   :  { %473 = vmatprep.subr.mxu1 %v122_v56  ;;  %404 = vmatprep.subr.mxu0 %v104_v57  ;;  %v2977_v56 = vld [vmem:[#allocation4 + $0xf8] sm:$0xff]   ;;  %v145_v57 = vunpack.c.l.bf16 %v82_v43  ;;  %v111_v5 = vunpack.c.l.bf16 %v65_v55  ;;  %vm2120_vm6 = vcmask 392448   ;;  %vm2558_vm7 = vcmask 523648  }
  0x3e   :  { %474 = vmatpush1.msra.mxu1 %v121_v58  ;;  %405 = vmatpush1.msra.mxu0 %v103_v60  ;;  %v4007_v58 = vpack.i.bf16 %v2850_v45, %v2882_v46  ;;  %v2914_v60 = vunpack.c.h.bf16 %v3996_v49  ;;  %vm2672_vm11 = vcmask 785920   ;;  %vm2773_vm12 = vcmask 917248  }
  0x3f   :  { %475 = vmatprep.subr.mxu1 %v106_v61  ;;  %2791 = vmatmul.mubr.msk.f32.vlgmr.msra.gmra.mxu0 %vm179_vm1, %v3965_v35  ;;  %v127_v61 = vunpack.c.l.bf16 %v73_v44  ;;  %v4065_v44 = vld [vmem:[#allocation4 + $0xa0] sm:$0xff]   ;;  %vm2775_vm13 = vcmask 1048448  }
  0x40   :  { %476 = vmatpush1.msra.mxu1 %v105_v63  ;;  %2795 = vmatprep.subr.msk.mxu0 %vm183_vm0, %v172_v2  ;;  %v66_v63 = vld [vmem:[#allocation2 + $0x38] sm:$0xff]  ;;  %v129_v2 = vunpack.c.l.bf16 %v74_v52 }
  0x41   :  { %509 = vmatprep.mubr.f32.mxu1 %v4990_v0  ;;  %2796 = vmatpush1.msk.msra.mxu0 %vm183_vm0, %v171_v3  ;;  %v112_v3 = vunpack.c.h.bf16 %v65_v55  ;;  %v4083_v55 = vld [vmem:[#allocation4 + $0x18] sm:$0xff]  }
  0x42   :  { %2798 = vmatprep.subr.msk.mxu1 %vm183_vm0, %v174_v4  ;;  %2794 = vmatmul.mubr.msk.f32.vlgmr.msra.gmra.mxu1 %vm179_vm1, %v3965_v35  ;;  %v2946_v4 = vunpack.c.h.bf16 %v2977_v56 }
  0x43   :  { %540 = vmatprep.subr.mxu0 %v156_v7  ;;  %2799 = vmatpush1.msk.msra.mxu1 %vm183_vm0, %v173_v8  ;;  %v114_v7 = vunpack.c.h.bf16 %v66_v63  ;;  %v4014_v8 = vpack.i.bf16 %v2914_v60, %v2849_v59 }
  0x44   :  { %541 = vmatpush1.msra.mxu0 %v155_v9  ;;  %611 = vmatprep.subr.mxu1 %v158_v12  ;;  %v113_v9 = vunpack.c.l.bf16 %v66_v63  ;;  %v4016_v11 = vpack.i.bf16 %v2946_v4, %v2881_v1  ;;  %v2945_v12 = vunpack.c.l.bf16 %v2977_v56  ;;  %v2834_v63 = vunpack.c.h.bf16 %v4083_v55 }
  0x45   :  { %542 = vmatprep.subr.mxu0 %v140_v13  ;;  %612 = vmatpush1.msra.mxu1 %v157_v14  ;;  %v2878_v13 = vunpack.c.h.bf16 %v2960_v6  ;;  %v2913_v14 = vunpack.c.l.bf16 %v3996_v49  ;;  %v2902_v49 = vunpack.c.h.bf16 %v4065_v44 }
  0x46   :  { %543 = vmatpush1.msra.mxu0 %v139_v15  ;;  %613 = vmatprep.subr.mxu1 %v142_v18  ;;  %v2846_v15 = vunpack.c.h.bf16 %v2952_v10  ;;  %v2968_v18 = vld [vmem:[#allocation4 + $0xb0] sm:$0xff]  }
  0x47   :  { %544 = vmatprep.subr.mxu0 %v124_v19  ;;  %614 = vmatpush1.msra.mxu1 %v141_v20  ;;  %v4027_v17 = vpack.i.bf16 %v2945_v12, %v2878_v13  ;;  %v2942_v19 = vunpack.c.h.bf16 %v2976_v16  ;;  %v2877_v20 = vunpack.c.l.bf16 %v2960_v6  ;;  %v2910_v22 = vunpack.c.h.bf16 %v2968_v18  ;;  %v4111_v6 = vld [vmem:[#allocation4 + $0xd0] sm:$0xff]  }
  0x48   :  { %545 = vmatpush1.msra.mxu0 %v123_v21  ;;  %615 = vmatprep.subr.mxu1 %v126_v23  ;;  %v4035_v21 = vpack.i.bf16 %v2913_v14, %v2846_v15  ;;  %v2845_v23 = vunpack.c.l.bf16 %v2952_v10 }
  0x49   :  { %546 = vmatprep.subr.mxu0 %v108_v24  ;;  %616 = vmatpush1.msra.mxu1 %v125_v25  ;;  %v2959_v24 = vld [vmem:[#allocation4 + $0x68] sm:$0xff]   ;;  %v2941_v25 = vunpack.c.l.bf16 %v2976_v16 }
  0x4a   :  { %547 = vmatpush1.msra.mxu0 %v107_v26  ;;  %580 = vmatprep.mubr.f32.mxu0 %v4990_v0  ;;  %v4039_v26 = vpack.i.bf16 %v2942_v19, %v2877_v20  ;;  %v2874_v29 = vunpack.c.h.bf16 %v2959_v24  ;;  %v4047_v31 = vpack.i.bf16 %v2910_v22, %v2845_v23 }
  0x4b   :  { %617 = vmatprep.subr.mxu1 %v110_v28  ;;  %2797 = vmatmul.mubr.msk.f32.vlgmr.msra.gmra.mxu0 %vm179_vm1, %v3965_v35  ;;  %v2909_v28 = vunpack.c.l.bf16 %v2968_v18 }
  0x4c   :  { %618 = vmatpush1.msra.mxu1 %v109_v30  ;;  %2801 = vmatprep.subr.msk.mxu0 %vm183_vm0, %v176_v32  ;;  %v4045_v30 = vld [vmem:[#allocation4 + $0xa8] sm:$0xff]   ;;  %v4056_v39 = vpack.i.bf16 %v2941_v25, %v2874_v29 }
  0x4d   :  { %651 = vmatprep.mubr.f32.mxu1 %v4990_v0  ;;  %2802 = vmatpush1.msk.msra.mxu0 %vm183_vm0, %v175_v36  ;;  %v2906_v34 = vunpack.c.h.bf16 %v4045_v30  ;;  %v2873_v36 = vunpack.c.l.bf16 %v2959_v24  ;;  %v2905_v43 = vunpack.c.l.bf16 %v4045_v30  ;;  %v4149_v24 = vld [vmem:[#allocation4 + $0xc8] sm:$0xff]  }
  0x4e   :  { %2804 = vmatprep.subr.msk.mxu1 %vm183_vm0, %v178_v37  ;;  %2800 = vmatmul.mubr.msk.f32.vlgmr.msra.gmra.mxu1 %vm179_vm1, %v3965_v35  ;;  %v4053_v37 = vld [vmem:[#allocation4 + $0x60] sm:$0xff]  }
  0x4f   :  { %682 = vmatprep.subr.mxu0 %v160_v40  ;;  %2805 = vmatpush1.msk.msra.mxu1 %vm183_vm0, %v177_v41  ;;  %v4058_v40 = vld [vmem:[#allocation4 + $0xe0] sm:$0xff]  }
  0x50   :  { %683 = vmatpush1.msra.mxu0 %v159_v42  ;;  %753 = vmatprep.subr.mxu1 %v162_v47  ;;  %v4060_v41 = vld [vmem:[#allocation4 + $0x20] sm:$0xff]   ;;  %v2841_v42 = vunpack.c.l.bf16 %v2951_v27  ;;  %v2934_v47 = vunpack.c.h.bf16 %v4058_v40  ;;  %v2933_v52 = vunpack.c.l.bf16 %v4058_v40 }
  0x51   :  { %684 = vmatprep.subr.mxu0 %v144_v48  ;;  %754 = vmatpush1.msra.mxu1 %v161_v50  ;;  %v2838_v48 = vunpack.c.h.bf16 %v4060_v41  ;;  %v2869_v50 = vunpack.c.l.bf16 %v4053_v37  ;;  %v2837_v56 = vunpack.c.l.bf16 %v4060_v41 }
  0x52   :  { %685 = vmatpush1.msra.mxu0 %v143_v51  ;;  %755 = vmatprep.subr.mxu1 %v146_v53  ;;  %v4076_v51 = vld [vmem:[#allocation4 + $0x58] sm:$0xff]  }
  0x53   :  { %686 = vmatprep.subr.mxu0 %v128_v54  ;;  %756 = vmatpush1.msra.mxu1 %v145_v57  ;;  %v4081_v54 = vld [vmem:[#allocation4 + $0xd8] sm:$0xff]   ;;  %v2901_v57 = vunpack.c.l.bf16 %v4065_v44 }
  0x54   :  { %3359 = vrot.lane.b32.xlu0 %v4007_v58, %s3912_s8  ;;  %687 = vmatpush1.msra.mxu0 %v127_v61  ;;  %v2866_v61 = vunpack.c.h.bf16 %v4076_v51 }
  0x55   :  { %757 = vmatprep.subr.mxu1 %v130_v62  ;;  %688 = vmatprep.subr.mxu0 %v112_v3  ;;  %v2930_v62 = vunpack.c.h.bf16 %v4081_v54  ;;  %v4104_v3 = vld [vmem:[#allocation4 + $0x50] sm:$0xff]   ;;  %v4201_v40 = vpack.i.bf16 %v2901_v57, %v2834_v63 }
  0x56   :  { %758 = vmatpush1.msra.mxu1 %v129_v2  ;;  %689 = vmatpush1.msra.mxu0 %v111_v5  ;;  %v2865_v2 = vunpack.c.l.bf16 %v4076_v51  ;;  %v4191_v41 = vpack.i.bf16 %v2933_v52, %v2866_v61 }
  0x57   :  { %722 = vmatprep.mubr.f32.mxu0 %v4990_v0  ;;  %759 = vmatprep.subr.mxu1 %v114_v7  ;;  %v4113_v7 = vld [vmem:[#allocation4 + $0x10] sm:$0xff]  }
  0x58   :  { %3369 = vrot.lane.b32.xlu1 %v4014_v8, %s3912_s8  ;;  %2803 = vmatmul.mubr.msk.f32.vlgmr.msra.gmra.mxu0 %vm179_vm1, %v3965_v35  ;;  %v2830_v16 = vunpack.c.h.bf16 %v4113_v7  ;;  %v4211_v44 = vpack.i.bf16 %v2930_v62, %v2865_v2 }
  0x59   :  { %760 = vmatpush1.msra.mxu1 %v113_v9  ;;  %3364 = vrot.lane.b32.xlu0 %v4016_v11, %s3912_s8  ;;  %v2833_v9 = vunpack.c.l.bf16 %v4083_v55 }
  0x5a   :  { %793 = vmatprep.mubr.f32.mxu1 %v4990_v0  ;;  %2978 = vmatprep.subr.mxu0 %v2882_v46  ;;  %v2870_v46 = vunpack.c.h.bf16 %v4053_v37  ;;  %v4182_v37 = vld [vmem:[#allocation4 + $0x40] sm:$0xff]  }
  0x5b   :  { %3013 = vmatprep.subr.mxu1 %v2946_v4  ;;  %2806 = vmatmul.mubr.msk.f32.vlgmr.msra.gmra.mxu1 %vm179_vm1, %v3965_v35  ;;  %v4041_v35 = vld [vmem:[#allocation4 + $0xe8] sm:$0xff]   ;;  %v2929_v4 = vunpack.c.l.bf16 %v4081_v54 }
  0x5c   :  { %2979 = vmatpush3.msra.mxu0 %v2850_v45  ;;  %3014 = vmatpush3.msra.mxu1 %v2914_v60  ;;  %v2938_v32 = vunpack.c.h.bf16 %v4041_v35  ;;  %v2937_v38 = vunpack.c.l.bf16 %v4041_v35  ;;  %v4067_v45 = vpack.i.bf16 %v2909_v28, %v2842_v33  ;;  %v4091_v60 = vpack.i.bf16 %v2906_v34, %v2841_v42 }
  0x5d   :  { %2980 = vmatprep.subr.mxu0 %v2881_v1  ;;  %3015 = vmatprep.subr.mxu1 %v2945_v12  ;;  %v4119_v12 = vld [vmem:[#allocation4 + $0x90] sm:$0xff]   ;;  %v2829_v35 = vunpack.c.l.bf16 %v4113_v7 }
  0x5e   :  { %3374 = vrot.lane.b32.xlu1 %v4027_v17, %s3912_s8  ;;  %2981 = vmatpush3.msra.mxu0 %v2849_v59  ;;  %v4079_v53 = vpack.i.bf16 %v2938_v32, %v2873_v36  ;;  %v4089_v59 = vld [vmem:[#allocation4 + $0x98] sm:$0xff]   ;;  %v4109_v5 = vpack.i.bf16 %v2937_v38, %v2870_v46  ;;  %v2894_v18 = vunpack.c.h.bf16 %v4119_v12  ;;  %v2893_v27 = vunpack.c.l.bf16 %v4119_v12  ;;  %v4296_v12 = vld [vmem:[#allocation6 + $0x20] sm:$0xff] }
  0x5f   :  { %3016 = vmatpush3.msra.mxu1 %v2913_v14  ;;  %3379 = vrot.lane.b32.xlu0 %v4035_v21, %s3912_s8  ;;  %v2898_v1 = vunpack.c.h.bf16 %v4089_v59  ;;  %v2897_v10 = vunpack.c.l.bf16 %v4089_v59  ;;  %v2862_v14 = vunpack.c.h.bf16 %v4104_v3  ;;  %5012 = vst [vmem:[#allocation14_spill] sm:$0xff] %v4296_v12 }
  0x60   :  { %2982 = vmatprep.subr.mxu0 %v2878_v13  ;;  %3017 = vmatprep.subr.mxu1 %v2942_v19  ;;  %v4125_v13 = vpack.i.bf16 %v2905_v43, %v2838_v48  ;;  %v2861_v19 = vunpack.c.l.bf16 %v4104_v3  ;;  %v4252_v59 = vpack.i.bf16 %v2894_v18, %v2829_v35 }
  0x61   :  { %2983 = vmatpush3.msra.mxu0 %v2846_v15  ;;  %3018 = vmatpush3.msra.mxu1 %v2910_v22  ;;  %v2926_v15 = vunpack.c.h.bf16 %v4111_v6  ;;  %v2925_v22 = vunpack.c.l.bf16 %v4111_v6  ;;  %v4227_v51 = vpack.i.bf16 %v2929_v4, %v2862_v14  ;;  %v4235_v55 = vpack.i.bf16 %v2897_v10, %v2830_v16 }
  0x62   :  { %2984 = vmatprep.subr.mxu0 %v2877_v20  ;;  %3019 = vmatprep.subr.mxu1 %v2941_v25  ;;  %v4140_v20 = vld [vmem:[#allocation4 + $0x48] sm:$0xff]  }
  0x63   :  { %3384 = vrot.lane.b32.xlu1 %v4039_v26, %s3912_s8  ;;  %2985 = vmatpush3.msra.mxu0 %v2845_v23  ;;  %v4147_v23 = vpack.i.bf16 %v2934_v47, %v2869_v50  ;;  %v4151_v25 = vld [vmem:[#allocation4 + $0x8] sm:$0xff]   ;;  %v2858_v30 = vunpack.c.h.bf16 %v4140_v20  ;;  %v4244_v54 = vpack.i.bf16 %v2926_v15, %v2861_v19 }
  0x64   :  { %3020 = vmatpush3.msra.mxu1 %v2909_v28  ;;  %3389 = vrot.lane.b32.xlu0 %v4047_v31, %s3912_s8  ;;  %v4159_v28 = vld [vmem:[#allocation4 + $0x88] sm:$0xff]  }
  0x65   :  { %2986 = vmatprep.subr.mxu0 %v2874_v29  ;;  %3021 = vmatprep.subr.mxu1 %v2938_v32  ;;  %v4167_v29 = vpack.i.bf16 %v2902_v49, %v2837_v56  ;;  %v2922_v32 = vunpack.c.h.bf16 %v4149_v24 }
  0x66   :  { %2987 = vmatpush3.msra.mxu0 %v2842_v33  ;;  %3022 = vmatpush3.msra.mxu1 %v2906_v34  ;;  %v2826_v33 = vunpack.c.h.bf16 %v4151_v25  ;;  %v2890_v34 = vunpack.c.h.bf16 %v4159_v28 }
  0x67   :  { %2988 = vmatprep.subr.mxu0 %v2873_v36  ;;  %3023 = vmatprep.subr.mxu1 %v2937_v38  ;;  %v2857_v36 = vunpack.c.l.bf16 %v4140_v20  ;;  %v2921_v38 = vunpack.c.l.bf16 %v4149_v24  ;;  %v4219_v24 = vpack.i.bf16 %v2898_v1, %v2833_v9 }
  0x68   :  { %3394 = vrot.lane.b32.xlu1 %v4056_v39, %s3912_s8  ;;  %2989 = vmatpush3.msra.mxu0 %v2841_v42  ;;  %v2970_v42 = vld [vmem:[#allocation4 + $0xc0] sm:$0xff]  }
  0x69   :  { %3024 = vmatpush3.msra.mxu1 %v2905_v43  ;;  %3399 = vrot.lane.b32.xlu0 %v4067_v45, %s3912_s8  ;;  %v2820_v43 = vld [vmem:[#allocation4] sm:$0xff]   ;;  %v2917_v20 = vunpack.c.l.bf16 %v2970_v42 }
  0x6a   :  { %2990 = vmatprep.subr.mxu0 %v2870_v46  ;;  %3025 = vmatprep.subr.mxu1 %v2934_v47  ;;  %v2825_v46 = vunpack.c.l.bf16 %v4151_v25  ;;  %v2889_v47 = vunpack.c.l.bf16 %v4159_v28 }
  0x6b   :  { %2991 = vmatpush3.msra.mxu0 %v2838_v48  ;;  %3026 = vmatpush3.msra.mxu1 %v2902_v49  ;;  %v2962_v48 = vld [vmem:[#allocation4 + $0x80] sm:$0xff]   ;;  %v2854_v49 = vunpack.c.h.bf16 %v4182_v37 }
  0x6c   :  { %2992 = vmatprep.subr.mxu0 %v2869_v50  ;;  %3027 = vmatprep.subr.mxu1 %v2933_v52  ;;  %v2918_v50 = vunpack.c.h.bf16 %v2970_v42  ;;  %v2822_v52 = vunpack.c.h.bf16 %v2820_v43  ;;  %v4272_v3 = vpack.i.bf16 %v2890_v34, %v2825_v46 }
  0x6d   :  { %3404 = vrot.lane.b32.xlu1 %v4079_v53, %s3912_s8  ;;  %2993 = vmatpush3.msra.mxu0 %v2837_v56  ;;  %v2886_v56 = vunpack.c.h.bf16 %v2962_v48 }
  0x6e   :  { %3028 = vmatpush3.msra.mxu1 %v2901_v57  ;;  %3409 = vrot.lane.b32.xlu0 %v4091_v60, %s3912_s8  ;;  %v2821_v57 = vunpack.c.l.bf16 %v2820_v43  ;;  %5008 = vst [vmem:[#allocation10_spill] sm:$0xff] %v4272_v3  ;;  %v4280_v6 = vpack.i.bf16 %v2889_v47, %v2822_v52 }
  0x6f   :  { %2994 = vmatprep.subr.mxu0 %v2866_v61  ;;  %3029 = vmatprep.subr.mxu1 %v2930_v62  ;;  %v2853_v61 = vunpack.c.l.bf16 %v4182_v37  ;;  %v4258_v62 = vpack.i.bf16 %v2925_v22, %v2858_v30 }
  0x70   :  { %2995 = vmatpush3.msra.mxu0 %v2834_v63  ;;  %3030 = vmatpush3.msra.mxu1 %v2898_v1  ;;  %v2885_v63 = vunpack.c.l.bf16 %v2962_v48  ;;  %v4264_v1 = vpack.i.bf16 %v2893_v27, %v2826_v33  ;;  %5009 = vst [vmem:[#allocation11_spill] sm:$0xff] %v4280_v6 }
  0x71   :  { %2996 = vmatprep.subr.mxu0 %v2865_v2  ;;  %3031 = vmatprep.subr.mxu1 %v2929_v4  ;;  %v4268_v2 = vpack.i.bf16 %v2922_v32, %v2857_v36  ;;  %v4276_v4 = vpack.i.bf16 %v2921_v38, %v2854_v49  ;;  %v4284_v7 = vpack.i.bf16 %v2918_v50, %v2853_v61 }
  0x72   :  { %3414 = vrot.lane.b32.xlu1 %v4109_v5, %s3912_s8  ;;  %2997 = vmatpush3.msra.mxu0 %v2833_v9  ;;  %5007 = vst [vmem:[#allocation9_spill] sm:$0xff] %v4264_v1  ;;  %v4288_v9 = vpack.i.bf16 %v2886_v56, %v2821_v57 }
  0x73   :  { %3032 = vmatpush3.msra.mxu1 %v2897_v10  ;;  %3419 = vrot.lane.b32.xlu0 %v4125_v13, %s3912_s8  ;;  %5010 = vst [vmem:[#allocation12_spill] sm:$0xff] %v4284_v7  ;;  %v4292_v10 = vpack.i.bf16 %v2885_v63, %v2917_v20 }
  0x74   :  { %2998 = vmatprep.subr.mxu0 %v2862_v14  ;;  %3033 = vmatprep.subr.mxu1 %v2926_v15  ;;  %5011 = vst [vmem:[#allocation13_spill] sm:$0xff] %v4288_v9  ;;  %v4300_v14 = vld [vmem:[#allocation6 + $0x18] sm:$0xff]  ;;  %v4304_v15 = vld [vmem:[#allocation6] ss:$0 sm:$0xff] }
  0x75   :  { %2999 = vmatpush3.msra.mxu0 %v2830_v16  ;;  %3034 = vmatpush3.msra.mxu1 %v2894_v18  ;;  %5013 = vst [vmem:[#allocation15_spill] sm:$0xff] %v4304_v15  ;;  %v4308_v16 = vld [vmem:[#allocation6 + $0x10] sm:$0xff]  ;;  %v4314_v18 = vld [vmem:[#allocation6 + $0x8] sm:$0xff] }
  0x76   :  { %3000 = vmatprep.subr.mxu0 %v2861_v19  ;;  %3035 = vmatprep.subr.mxu1 %v2925_v22 }
  0x77   :  { %3424 = vrot.lane.b32.xlu1 %v4147_v23, %s3912_s8  ;;  %3001 = vmatpush3.msra.mxu0 %v2829_v35 }
  0x78   :  { %3036 = vmatpush3.msra.mxu1 %v2893_v27  ;;  %3429 = vrot.lane.b32.xlu0 %v4167_v29, %s3912_s8 }
  0x79   :  { %3002 = vmatprep.subr.mxu0 %v2858_v30  ;;  %3037 = vmatprep.subr.mxu1 %v2922_v32 }
  0x7a   :  { %3003 = vmatpush3.msra.mxu0 %v2826_v33  ;;  %3038 = vmatpush3.msra.mxu1 %v2890_v34 }
  0x7b   :  { %3004 = vmatprep.subr.mxu0 %v2857_v36  ;;  %3039 = vmatprep.subr.mxu1 %v2921_v38 }
  0x7c   :  { %3434 = vrot.lane.b32.xlu1 %v4191_v41, %s3912_s8  ;;  %3005 = vmatpush3.msra.mxu0 %v2825_v46 }
  0x7d   :  { %3040 = vmatpush3.msra.mxu1 %v2889_v47  ;;  %3439 = vrot.lane.b32.xlu0 %v4201_v40, %s3912_s8 }
  0x7e   :  { %3006 = vmatprep.subr.mxu0 %v2854_v49  ;;  %3041 = vmatprep.subr.mxu1 %v2918_v50 }
  0x7f   :  { %3007 = vmatpush3.msra.mxu0 %v2822_v52  ;;  %3042 = vmatpush3.msra.mxu1 %v2886_v56 }
  0x80   :  { %3008 = vmatprep.subr.mxu0 %v2853_v61  ;;  %3043 = vmatprep.subr.mxu1 %v2917_v20 }
  0x81   :  { %3444 = vrot.lane.b32.xlu1 %v4211_v44, %s3912_s8  ;;  %3009 = vmatpush3.msra.mxu0 %v2821_v57 }
  0x82   :  { %3044 = vmatpush3.msra.mxu1 %v2885_v63  ;;  %3449 = vrot.lane.b32.xlu0 %v4219_v24, %s3912_s8 }
  0x83   :  { %3284 = vmatprep.subr.mxu0 %v4990_v0 }
  0x85   :  { %3454 = vrot.lane.b32.xlu1 %v4227_v51, %s3912_s8 }
  0x86   :  { %3459 = vrot.lane.b32.xlu0 %v4235_v55, %s3912_s8 }
  0x89   :  { %3464 = vrot.lane.b32.xlu1 %v4244_v54, %s3912_s8 }
  0x8a   :  { %3469 = vrot.lane.b32.xlu0 %v4252_v59, %s3912_s8 }
  0x8d   :  { %3474 = vrot.lane.b32.xlu1 %v4258_v62, %s3912_s8 }
  0x8e   :  { %3479 = vrot.lane.b32.xlu0 %v4264_v1, %s3912_s8 }
  0x91   :  { %3484 = vrot.lane.b32.xlu1 %v4268_v2, %s3912_s8 }
  0x92   :  { %3489 = vrot.lane.b32.xlu0 %v4272_v3, %s3912_s8 }
  0x95   :  { %3494 = vrot.lane.b32.xlu1 %v4276_v4, %s3912_s8 }
  0x96   :  { %3499 = vrot.lane.b32.xlu0 %v4280_v6, %s3912_s8 }
  0x99   :  { %3504 = vrot.lane.b32.xlu1 %v4284_v7, %s3912_s8 }
  0x9a   :  { %3509 = vrot.lane.b32.xlu0 %v4288_v9, %s3912_s8 }
  0x9d   :  { %3514 = vrot.lane.b32.xlu1 %v4292_v10, %s3912_s8 }
  0x9e   :  { %1596 = vrot.lane.b32.xlu0 %v4296_v12, %s3913_s9 }
  0xa1   :  { %1594 = vrot.lane.b32.xlu1 %v4300_v14, %s3913_s9 }
  0xa2   :  { %1439 = vrot.lane.b32.xlu0 %v4304_v15, %s3912_s8 }
  0xa5   :  { %1592 = vrot.lane.b32.xlu1 %v4308_v16, %s3913_s9 }
  0xa6   :  { %3519 = vrot.lane.b32.xlu0 %v4007_v58, %s3904_s18 }
  0xa9   :  { %1590 = vrot.lane.b32.xlu1 %v4314_v18, %s3913_s9 }
  0xaa   :  { %3524 = vrot.lane.b32.xlu0 %v4016_v11, %s3904_s18 }
  0xad   :  { %3529 = vrot.lane.b32.xlu1 %v4014_v8, %s3904_s18 }
  0xae   :  { %3534 = vrot.lane.b32.xlu0 %v4027_v17, %s3904_s18 }
  0xb1   :  { %3539 = vrot.lane.b32.xlu1 %v4035_v21, %s3904_s18 }
  0xb2   :  { %3544 = vrot.lane.b32.xlu0 %v4039_v26, %s3904_s18 }
  0xb5   :  { %3549 = vrot.lane.b32.xlu1 %v4047_v31, %s3904_s18 }
  0xb6   :  { %3554 = vrot.lane.b32.xlu0 %v4056_v39, %s3904_s18 }
  0xb9   :  { %3559 = vrot.lane.b32.xlu1 %v4067_v45, %s3904_s18 }
  0xba   :  { %3564 = vrot.lane.b32.xlu0 %v4079_v53, %s3904_s18 }
  0xbd   :  { %3569 = vrot.lane.b32.xlu1 %v4091_v60, %s3904_s18 }
  0xbe   :  { %3574 = vrot.lane.b32.xlu0 %v4109_v5, %s3904_s18 }
  0xc1   :  { %3579 = vrot.lane.b32.xlu1 %v4125_v13, %s3904_s18 }
  0xc2   :  { %3584 = vrot.lane.b32.xlu0 %v4147_v23, %s3904_s18 }
  0xc5   :  { %3589 = vrot.lane.b32.xlu1 %v4167_v29, %s3904_s18 }
  0xc6   :  { %v3360_v19 = vpop.permute.xlu0 %3359  ;;  %3594 = vrot.lane.b32.xlu0 %v4191_v41, %s3904_s18 }
  0xc7   :  { %v3361_v22 = vunpack.i.l.bf16 %v3360_v19  ;;  %v3362_v0 = vunpack.i.h.bf16 %v3360_v19 }
  0xc9   :  { %3053 = vmatprep.subr.mxu1 %v3361_v22  ;;  %3599 = vrot.lane.b32.xlu1 %v4201_v40, %s3904_s18 }
  0xca   :  { %v4352_v25 = vpop.permute.xlu1 %3369  ;;  %3604 = vrot.lane.b32.xlu0 %v4211_v44, %s3904_s18 }
  0xcb   :  { %v4356_v35 = vpop.permute.xlu0 %3364 }
  0xcd   :  { %3609 = vrot.lane.b32.xlu1 %v4219_v24, %s3904_s18 }
  0xce   :  { %3614 = vrot.lane.b32.xlu0 %v4227_v51, %s3904_s18 }
  0xd0   :  { %v4362_v27 = vpop.permute.xlu1 %3374 }
  0xd1   :  { %3619 = vrot.lane.b32.xlu1 %v4235_v55, %s3904_s18  ;;  %v4366_v28 = vpop.permute.xlu0 %3379 }
  0xd2   :  { %3624 = vrot.lane.b32.xlu0 %v4244_v54, %s3904_s18 }
  0xd5   :  { %v4370_v30 = vpop.permute.xlu1 %3384  ;;  %3629 = vrot.lane.b32.xlu1 %v4252_v59, %s3904_s18 }
  0xd6   :  { %v4374_v32 = vpop.permute.xlu0 %3389  ;;  %3634 = vrot.lane.b32.xlu0 %v4258_v62, %s3904_s18  ;;  %v3386_v19 = vunpack.i.l.bf16 %v4370_v30 }
  0xd7   :  { %5014 = vst [vmem:[#allocation16_spill] sm:$0xff] %v4374_v32 }
  0xd9   :  { %3639 = vrot.lane.b32.xlu1 %v4264_v1, %s3904_s18 }
  0xda   :  { %v4380_v33 = vpop.permute.xlu1 %3394  ;;  %3644 = vrot.lane.b32.xlu0 %v4268_v2, %s3904_s18 }
  0xdb   :  { %5015 = vst [vmem:[#allocation17_spill] sm:$0xff] %v4380_v33  ;;  %v4384_v34 = vpop.permute.xlu0 %3399 }
  0xdc   :  { %5016 = vst [vmem:[#allocation18_spill] sm:$0xff] %v4384_v34 }
  0xdd   :  { %3649 = vrot.lane.b32.xlu1 %v4272_v3, %s3904_s18  ;;  %v3366_v3 = vunpack.i.l.bf16 %v4356_v35 }
  0xde   :  { %3654 = vrot.lane.b32.xlu0 %v4276_v4, %s3904_s18 }
  0xdf   :  { %v4388_v36 = vpop.permute.xlu1 %3404 }
  0xe0   :  { %5017 = vst [vmem:[#allocation19_spill] sm:$0xff] %v4388_v36  ;;  %v4392_v37 = vpop.permute.xlu0 %3409 }
  0xe1   :  { %5018 = vst [vmem:[#allocation20_spill] sm:$0xff] %v4392_v37  ;;  %3659 = vrot.lane.b32.xlu1 %v4280_v6, %s3904_s18 }
  0xe2   :  { %3664 = vrot.lane.b32.xlu0 %v4284_v7, %s3904_s18  ;;  %v3371_v7 = vunpack.i.l.bf16 %v4352_v25 }
  0xe4   :  { %v4398_v38 = vpop.permute.xlu1 %3414 }
  0xe5   :  { %3669 = vrot.lane.b32.xlu1 %v4288_v9, %s3904_s18  ;;  %v4402_v42 = vpop.permute.xlu0 %3419 }
  0xe6   :  { %3674 = vrot.lane.b32.xlu0 %v4292_v10, %s3904_s18 }
  0xe9   :  { %v4404_v43 = vpop.permute.xlu1 %3424  ;;  %2034 = vrot.lane.b32.xlu1 %v4296_v12, %s3912_s8 }
  0xea   :  { %v4408_v46 = vpop.permute.xlu0 %3429  ;;  %2032 = vrot.lane.b32.xlu0 %v4300_v14, %s3912_s8 }
  0xed   :  { %1881 = vrot.lane.b32.xlu1 %v4304_v15, %s3904_s18  ;;  %v3381_v15 = vunpack.i.l.bf16 %v4366_v28 }
  0xee   :  { %v4412_v47 = vpop.permute.xlu1 %3434  ;;  %2030 = vrot.lane.b32.xlu0 %v4308_v16, %s3912_s8 }
  0xef   :  { %v4414_v48 = vpop.permute.xlu0 %3439 }
  0xf1   :  { %3679 = vrot.lane.b32.xlu1 %v4007_v58, %s3915_s10 }
  0xf2   :  { %2028 = vrot.lane.b32.xlu0 %v4314_v18, %s3912_s8 }
  0xf3   :  { %v4416_v49 = vpop.permute.xlu1 %3444 }
  0xf4   :  { %v298_v50 = vpop.f32.mrf.mxu0  ;;  %v4418_v56 = vpop.permute.xlu0 %3449 }
  0xf5   :  { %v369_v52 = vpop.f32.mrf.mxu1  ;;  %v800_v6 = vmax.f32 %v298_v50, 0.0  ;;  %v5021_v50 = vmov 0.0   ;;  %3684 = vrot.lane.b32.xlu1 %v4016_v11, %s3915_s10 }
  0xf6   :  { %v802_v61 = vmax.f32 %v369_v52, 0.0  ;;  %v300_v20 = vpop.f32.mrf.mxu0  ;;  %v3376_v52 = vunpack.i.l.bf16 %v4362_v27  ;;  %3689 = vrot.lane.b32.xlu0 %v4014_v8, %s3915_s10 }
  0xf7   :  { %v371_v57 = vpop.f32.mrf.mxu1  ;;  %v801_v63 = vmax.f32 %v300_v20, 0.0  ;;  %v4420_v9 = vpop.permute.xlu1 %3454 }
  0xf8   :  { %v803_v22 = vmax.f32 %v371_v57, 0.0  ;;  %v4424_v1 = vpop.permute.xlu0 %3459  ;;  %v3391_v57 = vunpack.i.l.bf16 %v4374_v32 }
  0xf9   :  { %1018 = vmatprep.mubr.f32.mxu0 %v801_v63  ;;  %5019 = vst [vmem:[#allocation21_spill] sm:$0xff] %v4424_v1  ;;  %3694 = vrot.lane.b32.xlu1 %v4027_v17, %s3915_s10 }
  0xfa   :  { %1088 = vmatprep.mubr.f32.mxu1 %v803_v22  ;;  %1019 = vmatmul.mubr.f32.vlgmr.msra.gmra.mxu0 %v800_v6  ;;  %v3367_v6 = vunpack.i.h.bf16 %v4356_v35  ;;  %v3411_v35 = vunpack.i.l.bf16 %v4392_v37  ;;  %v3431_v37 = vunpack.i.l.bf16 %v4408_v46 }
  0xfb   :  { %1089 = vmatmul.mubr.f32.vlgmr.msra.gmra.mxu1 %v802_v61  ;;  %v4428_v20 = vpop.permute.xlu1 %3464  ;;  %3285 = vmatpush3.msra.mxu0 %v4296_v12  ;;  %v3401_v61 = vunpack.i.l.bf16 %v4384_v34 }
  0xfc   :  { %3054 = vmatpush3.msra.mxu1 %v3362_v0  ;;  %5020 = vst [vmem:[#allocation22_spill] sm:$0xff] %v4428_v20  ;;  %3286 = vmatprep.subr.mxu0 %v5021_v50  ;;  %v4434_v63 = vpop.permute.xlu0 %3469  ;;  %v3396_v0 = vunpack.i.l.bf16 %v4380_v33  ;;  %v3421_v33 = vunpack.i.l.bf16 %v4402_v42 }
  0xfd   :  { %3055 = vmatprep.subr.mxu1 %v3366_v3  ;;  %3287 = vmatpush3.msra.mxu0 %v4300_v14 }
  0xfe   :  { %3056 = vmatpush3.msra.mxu1 %v3371_v7  ;;  %3288 = vmatprep.subr.mxu0 %v5021_v50  ;;  %v3406_v7 = vunpack.i.l.bf16 %v4388_v36  ;;  %v3436_v36 = vunpack.i.l.bf16 %v4412_v47 }
  0xff   :  { %3057 = vmatprep.subr.mxu1 %v3376_v52  ;;  %v4441_v3 = vpop.permute.xlu1 %3474  ;;  %v4443_v22 = vpop.f32.mrf.mxu0  ;;  %3289 = vmatpush3.msra.mxu0 %v4308_v16 }
 0x100   :  { %3058 = vmatpush3.msra.mxu1 %v3381_v15  ;;  %3290 = vmatprep.subr.mxu0 %v5021_v50  ;;  %v4449_v52 = vpop.permute.xlu0 %3479  ;;  %v3416_v15 = vunpack.i.l.bf16 %v4398_v38 }
 0x101   :  { %3059 = vmatprep.subr.mxu1 %v3386_v19  ;;  %v442_v12 = vpop.f32.mrf.mxu0  ;;  %3291 = vmatpush3.msra.mxu0 %v4314_v18  ;;  %v3426_v19 = vunpack.i.l.bf16 %v4404_v43 }
 0x102   :  { %3060 = vmatpush3.msra.mxu1 %v3391_v57  ;;  %v805_v34 = vmax.f32 %v442_v12, 0.0  ;;  %3088 = vmatprep.subr.mxu0 %v3367_v6  ;;  %v3441_v12 = vunpack.i.l.bf16 %v4414_v48  ;;  %v3446_v6 = vunpack.i.l.bf16 %v4416_v49  ;;  %v4540_v8 = vpop.f32.mrf.mxu1 }
 0x103   :  { %3061 = vmatprep.subr.mxu1 %v3396_v0  ;;  %v4456_v57 = vpop.permute.xlu1 %3484  ;;  %v3451_v0 = vunpack.i.l.bf16 %v4418_v56  ;;  %3292 = vmatprep.mubr.msk.f32.mxu0 %vm3914_vm2, %v5021_v50 }
 0x104   :  { %3062 = vmatpush3.msra.mxu1 %v3401_v61  ;;  %1506 = vmatprep.mubr.f32.mxu1 %v805_v34  ;;  %v4459_v32 = vpop.permute.xlu0 %3489  ;;  %v3456_v34 = vunpack.i.l.bf16 %v4420_v9  ;;  %v3461_v61 = vunpack.i.l.bf16 %v4424_v1  ;;  %v513_v11 = vpop.f32.mrf.mxu1 }
 0x105   :  { %3063 = vmatprep.subr.mxu1 %v3406_v7  ;;  %3704 = vrot.lane.b32.xlu1 %v4039_v26, %s3915_s10 }
 0x106   :  { %3064 = vmatpush3.msra.mxu1 %v3411_v35  ;;  %v3466_v35 = vunpack.i.l.bf16 %v4428_v20  ;;  %3699 = vrot.lane.b32.xlu0 %v4035_v21, %s3915_s10 }
 0x107   :  { %3065 = vmatprep.subr.mxu1 %v3416_v15  ;;  %v4466_v7 = vpop.permute.xlu1 %3494 }
 0x108   :  { %3066 = vmatpush3.msra.mxu1 %v3421_v33  ;;  %v4469_v15 = vpop.permute.xlu0 %3499  ;;  %v3471_v33 = vunpack.i.l.bf16 %v4434_v63 }
 0x109   :  { %3067 = vmatprep.subr.mxu1 %v3426_v19  ;;  %v3476_v19 = vunpack.i.l.bf16 %v4441_v3  ;;  %3714 = vrot.lane.b32.xlu1 %v4056_v39, %s3915_s10 }
 0x10a   :  { %3068 = vmatpush3.msra.mxu1 %v3431_v37  ;;  %v3481_v37 = vunpack.i.l.bf16 %v4449_v52  ;;  %3709 = vrot.lane.b32.xlu0 %v4047_v31, %s3915_s10 }
 0x10b   :  { %3069 = vmatprep.subr.mxu1 %v3436_v36  ;;  %v3486_v36 = vunpack.i.l.bf16 %v4456_v57  ;;  %v4476_v1 = vpop.permute.xlu1 %3504  ;;  %v4548_v21 = vpop.f32.mrf.mxu0 }
 0x10c   :  { %3070 = vmatpush3.msra.mxu1 %v3441_v12  ;;  %v3491_v12 = vunpack.i.l.bf16 %v4459_v32  ;;  %v4479_v20 = vpop.permute.xlu0 %3509 }
 0x10d   :  { %3071 = vmatprep.subr.mxu1 %v3446_v6  ;;  %v3496_v6 = vunpack.i.l.bf16 %v4466_v7  ;;  %3724 = vrot.lane.b32.xlu1 %v4079_v53, %s3915_s10  ;;  %v4558_v39 = vpop.f32.mrf.mxu0 }
 0x10e   :  { %3072 = vmatpush3.msra.mxu1 %v3451_v0  ;;  %v3501_v0 = vunpack.i.l.bf16 %v4469_v15  ;;  %3719 = vrot.lane.b32.xlu0 %v4067_v45, %s3915_s10  ;;  %v4556_v31 = vpop.f32.mrf.mxu1 }
 0x10f   :  { %3073 = vmatprep.subr.mxu1 %v3456_v34  ;;  %v3506_v34 = vunpack.i.l.bf16 %v4476_v1 }
 0x110   :  { %3074 = vmatpush3.msra.mxu1 %v3461_v61  ;;  %v3511_v61 = vunpack.i.l.bf16 %v4479_v20  ;;  %v4564_v45 = vpop.f32.mrf.mxu1 }
 0x111   :  { %3075 = vmatprep.subr.mxu1 %v3466_v35  ;;  %v804_v35 = vmax.f32 %v4443_v22, 0.0  ;;  %3734 = vrot.lane.b32.xlu1 %v4109_v5, %s3915_s10 }
 0x112   :  { %3076 = vmatpush3.msra.mxu1 %v3471_v33  ;;  %v4485_v33 = vpop.permute.xlu1 %3514  ;;  %3729 = vrot.lane.b32.xlu0 %v4091_v60, %s3915_s10 }
 0x113   :  { %3077 = vmatprep.subr.mxu1 %v3476_v19  ;;  %v1597_v19 = vpop.permute.xlu0 %1596 }
 0x114   :  { %3078 = vmatpush3.msra.mxu1 %v3481_v37 }
 0x115   :  { %3079 = vmatprep.subr.mxu1 %v3486_v36  ;;  %3744 = vrot.lane.b32.xlu1 %v4147_v23, %s3915_s10 }
 0x116   :  { %3080 = vmatpush3.msra.mxu1 %v3491_v12  ;;  %v1595_v37 = vpop.permute.xlu1 %1594  ;;  %3739 = vrot.lane.b32.xlu0 %v4125_v13, %s3915_s10 }
 0x117   :  { %3081 = vmatprep.subr.mxu1 %v3496_v6  ;;  %v4490_v36 = vpop.permute.xlu0 %1439 }
 0x118   :  { %3082 = vmatpush3.msra.mxu1 %v3501_v0  ;;  %v4568_v60 = vpop.f32.mrf.mxu0 }
 0x119   :  { %3083 = vmatprep.subr.mxu1 %v3506_v34  ;;  %3754 = vrot.lane.b32.xlu1 %v4191_v41, %s3915_s10 }
 0x11a   :  { %3084 = vmatpush3.msra.mxu1 %v3511_v61  ;;  %v1593_v22 = vpop.permute.xlu1 %1592  ;;  %3749 = vrot.lane.b32.xlu0 %v4167_v29, %s3915_s10  ;;  %v4578_v23 = vpop.f32.mrf.mxu0 }
 0x11b   :  { %1507 = vmatmul.mubr.f32.vlgmr.msra.gmra.mxu1 %v804_v35  ;;  %3295 = vmatprep.subr.mxu1 %v5021_v50  ;;  %v4493_v12 = vpop.permute.xlu0 %3519  ;;  %v4572_v13 = vpop.f32.mrf.mxu1  ;;  %v5022_v35 = vld [vmem:[#allocation15_spill] sm:$0xff] }
 0x11c   :  { %3296 = vmatpush3.msra.mxu1 %v1597_v19  ;;  %3303 = vmatprep.mubr.msk.f32.mxu1 %vm3914_vm2, %v5021_v50 }
 0x11d   :  { %3297 = vmatprep.subr.mxu1 %v5021_v50  ;;  %3764 = vrot.lane.b32.xlu1 %v4211_v44, %s3915_s10  ;;  %v4580_v29 = vpop.f32.mrf.mxu1 }
 0x11e   :  { %3298 = vmatpush3.msra.mxu1 %v1595_v37  ;;  %v1591_v6 = vpop.permute.xlu1 %1590  ;;  %3759 = vrot.lane.b32.xlu0 %v4201_v40, %s3915_s10 }
 0x11f   :  { %3299 = vmatprep.subr.mxu1 %v5021_v50  ;;  %v4499_v0 = vpop.permute.xlu0 %3524 }
 0x120   :  { %3300 = vmatpush3.msra.mxu1 %v1593_v22  ;;  %v3527_v34 = vunpack.i.h.bf16 %v4499_v0  ;;  %v5023_v22 = vld [vmem:[#allocation9_spill] sm:$0xff] }
 0x121   :  { %3301 = vmatprep.subr.mxu1 %v5021_v50  ;;  %3774 = vrot.lane.b32.xlu1 %v4227_v51, %s3915_s10 }
 0x122   :  { %3302 = vmatpush3.msra.mxu1 %v1591_v6  ;;  %v4538_v58 = vpop.permute.xlu1 %3529  ;;  %3769 = vrot.lane.b32.xlu0 %v4219_v24, %s3915_s10  ;;  %v5024_v6 = vld [vmem:[#allocation12_spill] sm:$0xff] }
 0x123   :  { %3163 = vmatprep.subr.mxu1 %v3527_v34  ;;  %v4546_v17 = vpop.permute.xlu0 %3534  ;;  %v807_v34 = vmax.f32 %v513_v11, 0.0 }
 0x125   :  { %3784 = vrot.lane.b32.xlu1 %v4244_v54, %s3915_s10 }
 0x126   :  { %v4550_v26 = vpop.permute.xlu1 %3539  ;;  %3779 = vrot.lane.b32.xlu0 %v4235_v55, %s3915_s10 }
 0x127   :  { %v4566_v53 = vpop.permute.xlu0 %3544 }
 0x129   :  { %3794 = vrot.lane.b32.xlu1 %v4258_v62, %s3915_s10 }
 0x12a   :  { %v4570_v5 = vpop.permute.xlu1 %3549  ;;  %3789 = vrot.lane.b32.xlu0 %v4252_v59, %s3915_s10  ;;  %v3372_v59 = vunpack.i.h.bf16 %v4352_v25  ;;  %v5026_v25 = vld [vmem:[#allocation16_spill] sm:$0xff] }
 0x12b   :  { %v4582_v41 = vpop.permute.xlu0 %3554  ;;  %v3392_v11 = vunpack.i.h.bf16 %v5026_v25  ;;  %v5032_v25 = vld [vmem:[#allocation13_spill] sm:$0xff] }
 0x12d   :  { %3804 = vrot.lane.b32.xlu1 %v4268_v2, %s3915_s10 }
 0x12e   :  { %v4584_v40 = vpop.permute.xlu1 %3559  ;;  %3799 = vrot.lane.b32.xlu0 %v5023_v22, %s3915_s10  ;;  %v5029_v22 = vld [vmem:[#allocation19_spill] sm:$0xff] }
 0x12f   :  { %v4594_v62 = vpop.permute.xlu0 %3564 }
 0x131   :  { %3814 = vrot.lane.b32.xlu1 %v4276_v4, %s3915_s10  ;;  %v3377_v4 = vunpack.i.h.bf16 %v4362_v27  ;;  %v5027_v27 = vld [vmem:[#allocation17_spill] sm:$0xff] }
 0x132   :  { %v4597_v55 = vpop.permute.xlu1 %3569 }
 0x135   :  { %3824 = vrot.lane.b32.xlu1 %v5024_v6, %s3915_s10  ;;  %v5030_v6 = vld [vmem:[#allocation11_spill] sm:$0xff] }
 0x139   :  { %3834 = vrot.lane.b32.xlu1 %v4292_v10, %s3915_s10 }
 0x13d   :  { %2470 = vrot.lane.b32.xlu1 %v4300_v14, %s3916_s11 }
 0x141   :  { %2468 = vrot.lane.b32.xlu1 %v4308_v16, %s3916_s11 }
 0x1ba   :  { %v3010_v44 = vpop.f32.mrf.mxu0 }
 0x1bb   :  { %v3045_v51 = vpop.f32.mrf.mxu1 }
 0x1bc   :  { %v3011_v24 = vpop.f32.mrf.mxu0 }
 0x1bd   :  { %v3046_v54 = vpop.f32.mrf.mxu1  ;;  %v3012_v61 = vadd.f32 %v3011_v24, %v3010_v44  ;;  %v3382_v44 = vunpack.i.h.bf16 %v4366_v28  ;;  %v3387_v24 = vunpack.i.h.bf16 %v4370_v30  ;;  %v3397_v28 = vunpack.i.h.bf16 %v5027_v27 }
 0x1be   :  { %v3047_v37 = vadd.f32 %v3046_v54, %v3045_v51  ;;  %v4610_v51 = vpop.permute.xlu0 %3574  ;;  %v4613_v54 = vpop.permute.xlu1 %3579  ;;  %v3407_v30 = vunpack.i.h.bf16 %v5029_v22  ;;  %v3437_v27 = vunpack.i.h.bf16 %v4412_v47  ;;  %v5034_v47 = vld [vmem:[#allocation22_spill] sm:$0xff] }
 0x1bf   :  { %v1021_v19 = vadd.f32 %v3012_v61, %v5022_v35  ;;  %v5025_v61 = vld [vmem:[#allocation10_spill] sm:$0xff] }
 0x1c0   :  { %3809 = vrot.lane.b32.xlu0 %v5025_v61, %s3915_s10  ;;  %v3427_v61 = vunpack.i.h.bf16 %v4404_v43  ;;  %v3452_v43 = vunpack.i.h.bf16 %v4418_v56  ;;  %v3482_v56 = vunpack.i.h.bf16 %v4449_v52  ;;  %v3516_v52 = vunpack.i.l.bf16 %v4485_v33 }
 0x1c1   :  { %v4599_v2 = vadd.f32 %v3047_v37, %v1021_v19  ;;  %v5028_v19 = vld [vmem:[#allocation18_spill] sm:$0xff] }
 0x1c2   :  { %v3402_v37 = vunpack.i.h.bf16 %v5028_v19  ;;  %v4629_v10 = vpop.permute.xlu1 %3589 }
 0x1c3   :  { %3293 = vmatmul.mubr.msk.f32.vlgmr.msra.gmra.mxu0 %vm1095_vm3, %v4599_v2 }
 0x1c4   :  { %3089 = vmatpush3.msra.mxu0 %v3372_v59  ;;  %1576 = vmatprep.mubr.f32.mxu0 %v807_v34  ;;  %v5031_v59 = vld [vmem:[#allocation20_spill] sm:$0xff] }
 0x1c5   :  { %3090 = vmatprep.subr.mxu0 %v3377_v4  ;;  %3819 = vrot.lane.b32.xlu0 %v5030_v6, %s3915_s10  ;;  %v3412_v34 = vunpack.i.h.bf16 %v5031_v59  ;;  %v4626_v4 = vpop.permute.xlu0 %3584 }
 0x1c6   :  { %3091 = vmatpush3.msra.mxu0 %v3382_v44  ;;  %v3417_v44 = vunpack.i.h.bf16 %v4398_v38  ;;  %v3442_v38 = vunpack.i.h.bf16 %v4414_v48  ;;  %v4641_v19 = vpop.permute.xlu1 %3599  ;;  %v3472_v48 = vunpack.i.h.bf16 %v4434_v63  ;;  %v3502_v63 = vunpack.i.h.bf16 %v4469_v15 }
 0x1c7   :  { %3092 = vmatprep.subr.mxu0 %v3387_v24  ;;  %v3422_v24 = vunpack.i.h.bf16 %v4402_v42  ;;  %v3447_v42 = vunpack.i.h.bf16 %v4416_v49  ;;  %v3477_v49 = vunpack.i.h.bf16 %v4441_v3  ;;  %v3522_v15 = vunpack.i.h.bf16 %v4493_v12 }
 0x1c8   :  { %3093 = vmatpush3.msra.mxu0 %v3392_v11  ;;  %v3432_v11 = vunpack.i.h.bf16 %v4408_v46  ;;  %v5033_v46 = vld [vmem:[#allocation21_spill] sm:$0xff] }
 0x1c9   :  { %3094 = vmatprep.subr.mxu0 %v3397_v28  ;;  %3829 = vrot.lane.b32.xlu0 %v5032_v25, %s3915_s10  ;;  %v4638_v28 = vpop.permute.xlu0 %3594  ;;  %v3462_v22 = vunpack.i.h.bf16 %v5033_v46  ;;  %v3526_v25 = vunpack.i.l.bf16 %v4499_v0  ;;  %v3546_v0 = vunpack.i.l.bf16 %v4566_v53 }
 0x1ca   :  { %3095 = vmatpush3.msra.mxu0 %v3402_v37  ;;  %v3457_v37 = vunpack.i.h.bf16 %v4420_v9  ;;  %v4651_v59 = vpop.permute.xlu1 %3609  ;;  %v3487_v9 = vunpack.i.h.bf16 %v4456_v57 }
 0x1cb   :  { %3096 = vmatprep.subr.mxu0 %v3407_v30  ;;  %v3467_v30 = vunpack.i.h.bf16 %v5034_v47  ;;  %v3576_v47 = vunpack.i.l.bf16 %v4610_v51 }
 0x1cc   :  { %3097 = vmatpush3.msra.mxu0 %v3412_v34  ;;  %v3492_v34 = vunpack.i.h.bf16 %v4459_v32  ;;  %v3517_v32 = vunpack.i.h.bf16 %v4485_v33  ;;  %v3536_v33 = vunpack.i.l.bf16 %v4546_v17 }
 0x1cd   :  { %3098 = vmatprep.subr.mxu0 %v3417_v44  ;;  %v4648_v6 = vpop.permute.xlu0 %3604  ;;  %v3497_v44 = vunpack.i.h.bf16 %v4466_v7  ;;  %v3521_v7 = vunpack.i.l.bf16 %v4493_v12  ;;  %v3541_v12 = vunpack.i.l.bf16 %v4550_v26 }
 0x1ce   :  { %3099 = vmatpush3.msra.mxu0 %v3422_v24  ;;  %v3512_v24 = vunpack.i.h.bf16 %v4479_v20  ;;  %v4663_v57 = vpop.permute.xlu1 %3619  ;;  %v806_v20 = vmax.f32 %v4540_v8, 0.0  ;;  %v3551_v8 = vunpack.i.l.bf16 %v4570_v5 }
 0x1cf   :  { %3100 = vmatprep.subr.mxu0 %v3427_v61  ;;  %v3507_v61 = vunpack.i.h.bf16 %v4476_v1  ;;  %v809_v1 = vmax.f32 %v4558_v39, 0.0  ;;  %v3556_v39 = vunpack.i.l.bf16 %v4582_v41 }
 0x1d0   :  { %3101 = vmatpush3.msra.mxu0 %v3432_v11  ;;  %v3531_v11 = vunpack.i.l.bf16 %v4538_v58 }
 0x1d1   :  { %3102 = vmatprep.subr.mxu0 %v3437_v27  ;;  %v4659_v3 = vpop.permute.xlu0 %3614 }
 0x1d2   :  { %3103 = vmatpush3.msra.mxu0 %v3442_v38  ;;  %v4675_v38 = vpop.permute.xlu1 %3629 }
 0x1d3   :  { %3104 = vmatprep.subr.mxu0 %v3447_v42  ;;  %v3561_v42 = vunpack.i.l.bf16 %v4584_v40 }
 0x1d4   :  { %3105 = vmatpush3.msra.mxu0 %v3452_v43 }
 0x1d5   :  { %3106 = vmatprep.subr.mxu0 %v3457_v37  ;;  %v4672_v27 = vpop.permute.xlu0 %3624  ;;  %v3566_v37 = vunpack.i.l.bf16 %v4594_v62 }
 0x1d6   :  { %3107 = vmatpush3.msra.mxu0 %v3462_v22  ;;  %v4685_v46 = vpop.permute.xlu1 %3639  ;;  %v3571_v22 = vunpack.i.l.bf16 %v4597_v55 }
 0x1d7   :  { %3108 = vmatprep.subr.mxu0 %v3467_v30  ;;  %v3581_v30 = vunpack.i.l.bf16 %v4613_v54 }
 0x1d8   :  { %3109 = vmatpush3.msra.mxu0 %v3472_v48  ;;  %v3586_v48 = vunpack.i.l.bf16 %v4626_v4 }
 0x1d9   :  { %3110 = vmatprep.subr.mxu0 %v3477_v49  ;;  %v4682_v43 = vpop.permute.xlu0 %3634  ;;  %v3591_v49 = vunpack.i.l.bf16 %v4629_v10 }
 0x1da   :  { %3111 = vmatpush3.msra.mxu0 %v3482_v56 }
 0x1db   :  { %3112 = vmatprep.subr.mxu0 %v3487_v9  ;;  %v3596_v9 = vunpack.i.l.bf16 %v4638_v28 }
 0x1dc   :  { %3113 = vmatpush3.msra.mxu0 %v3492_v34  ;;  %v4695_v34 = vpop.permute.xlu1 %3649 }
 0x1dd   :  { %3114 = vmatprep.subr.mxu0 %v3497_v44  ;;  %v4692_v56 = vpop.permute.xlu0 %3644  ;;  %v3601_v44 = vunpack.i.l.bf16 %v4641_v19 }
 0x1de   :  { %3115 = vmatpush3.msra.mxu0 %v3502_v63  ;;  %v3606_v63 = vunpack.i.l.bf16 %v4648_v6 }
 0x1df   :  { %3116 = vmatprep.subr.mxu0 %v3507_v61  ;;  %v3616_v61 = vunpack.i.l.bf16 %v4659_v3 }
 0x1e0   :  { %3117 = vmatpush3.msra.mxu0 %v3512_v24  ;;  %v3611_v24 = vunpack.i.l.bf16 %v4651_v59 }
 0x1e1   :  { %3118 = vmatprep.subr.mxu0 %v3516_v52  ;;  %v3621_v52 = vunpack.i.l.bf16 %v4663_v57 }
 0x1e2   :  { %3119 = vmatpush3.msra.mxu0 %v3517_v32  ;;  %v4702_v32 = vpop.permute.xlu0 %3654 }
 0x1e3   :  { %1577 = vmatmul.mubr.f32.vlgmr.msra.gmra.mxu0 %v806_v20  ;;  %3128 = vmatprep.subr.mxu0 %v3521_v7  ;;  %v3626_v7 = vunpack.i.l.bf16 %v4672_v27  ;;  %v3631_v20 = vunpack.i.l.bf16 %v4675_v38 }
 0x1e4   :  { %3129 = vmatpush3.msra.mxu0 %v3522_v15  ;;  %1948 = vmatprep.mubr.f32.mxu0 %v809_v1  ;;  %v4705_v15 = vpop.permute.xlu1 %3659  ;;  %v3641_v1 = vunpack.i.l.bf16 %v4685_v46 }
 0x1e5   :  { %3130 = vmatprep.subr.mxu0 %v3526_v25  ;;  %v3636_v25 = vunpack.i.l.bf16 %v4682_v43 }
 0x1e6   :  { %3131 = vmatpush3.msra.mxu0 %v3531_v11  ;;  %v3646_v11 = vunpack.i.l.bf16 %v4692_v56 }
 0x1e7   :  { %3132 = vmatprep.subr.mxu0 %v3536_v33  ;;  %v3651_v33 = vunpack.i.l.bf16 %v4695_v34 }
 0x1e8   :  { %3133 = vmatpush3.msra.mxu0 %v3541_v12  ;;  %v4712_v12 = vpop.permute.xlu0 %3664 }
 0x1e9   :  { %3134 = vmatprep.subr.mxu0 %v3546_v0  ;;  %v3656_v0 = vunpack.i.l.bf16 %v4702_v32 }
 0x1ea   :  { %3135 = vmatpush3.msra.mxu0 %v3551_v8  ;;  %v4715_v8 = vpop.permute.xlu1 %3669 }
 0x1eb   :  { %3136 = vmatprep.subr.mxu0 %v3556_v39  ;;  %v3661_v39 = vunpack.i.l.bf16 %v4705_v15 }
 0x1ec   :  { %3137 = vmatpush3.msra.mxu0 %v3561_v42  ;;  %v3666_v42 = vunpack.i.l.bf16 %v4712_v12 }
 0x1ed   :  { %3138 = vmatprep.subr.mxu0 %v3566_v37  ;;  %v3671_v37 = vunpack.i.l.bf16 %v4715_v8 }
 0x1ee   :  { %3139 = vmatpush3.msra.mxu0 %v3571_v22  ;;  %v808_v22 = vmax.f32 %v4548_v21, 0.0 }
 0x1ef   :  { %3140 = vmatprep.subr.mxu0 %v3576_v47  ;;  %v4726_v47 = vpop.permute.xlu0 %3674 }
 0x1f0   :  { %3141 = vmatpush3.msra.mxu0 %v3581_v30  ;;  %v2035_v30 = vpop.permute.xlu1 %2034 }
 0x1f1   :  { %3142 = vmatprep.subr.mxu0 %v3586_v48  ;;  %v5035_v48 = vld [vmem:[#allocation14_spill] sm:$0xff] }
 0x1f2   :  { %3143 = vmatpush3.msra.mxu0 %v3591_v49  ;;  %2472 = vrot.lane.b32.xlu0 %v5035_v48, %s3916_s11 }
 0x1f3   :  { %3144 = vmatprep.subr.mxu0 %v3596_v9  ;;  %v2033_v21 = vpop.permute.xlu0 %2032 }
 0x1f4   :  { %3145 = vmatpush3.msra.mxu0 %v3601_v44  ;;  %v4738_v14 = vpop.permute.xlu1 %1881 }
 0x1f5   :  { %3146 = vmatprep.subr.mxu0 %v3606_v63 }
 0x1f6   :  { %3147 = vmatpush3.msra.mxu0 %v3611_v24  ;;  %2319 = vrot.lane.b32.xlu0 %v5022_v35, %s3915_s10 }
 0x1f7   :  { %3148 = vmatprep.subr.mxu0 %v3616_v61  ;;  %v2031_v49 = vpop.permute.xlu0 %2030 }
 0x1f8   :  { %3149 = vmatpush3.msra.mxu0 %v3621_v52  ;;  %v4741_v9 = vpop.permute.xlu1 %3679 }
 0x1f9   :  { %3150 = vmatprep.subr.mxu0 %v3626_v7 }
 0x1fa   :  { %3151 = vmatpush3.msra.mxu0 %v3631_v20  ;;  %2466 = vrot.lane.b32.xlu0 %v4314_v18, %s3916_s11 }
 0x1fb   :  { %3152 = vmatprep.subr.mxu0 %v3636_v25  ;;  %v2029_v44 = vpop.permute.xlu0 %2028  ;;  %v3085_v25 = vpop.f32.mrf.mxu1 }
 0x1fc   :  { %3153 = vmatpush3.msra.mxu0 %v3641_v1  ;;  %v4743_v16 = vpop.permute.xlu1 %3684 }
 0x1fd   :  { %3154 = vmatprep.subr.mxu0 %v3646_v11  ;;  %v3687_v35 = vunpack.i.h.bf16 %v4743_v16  ;;  %v3086_v1 = vpop.f32.mrf.mxu1 }
 0x1fe   :  { %3155 = vmatpush3.msra.mxu0 %v3651_v33 }
 0x1ff   :  { %3156 = vmatprep.subr.mxu0 %v3656_v0  ;;  %v4748_v61 = vpop.permute.xlu0 %3689  ;;  %v3087_v0 = vadd.f32 %v3086_v1, %v3085_v25  ;;  %v3542_v25 = vunpack.i.h.bf16 %v4550_v26  ;;  %v3562_v26 = vunpack.i.h.bf16 %v4584_v40  ;;  %v3592_v40 = vunpack.i.h.bf16 %v4629_v10 }
 0x200   :  { %3157 = vmatpush3.msra.mxu0 %v3661_v39  ;;  %v4750_v18 = vpop.permute.xlu1 %3694  ;;  %v3622_v10 = vunpack.i.h.bf16 %v4663_v57  ;;  %v3652_v57 = vunpack.i.h.bf16 %v4695_v34  ;;  %v3677_v34 = vunpack.i.h.bf16 %v4726_v47 }
 0x201   :  { %3158 = vmatprep.subr.mxu0 %v3666_v42 }
 0x202   :  { %3159 = vmatpush3.msra.mxu0 %v3671_v37 }
 0x203   :  { %1949 = vmatmul.mubr.f32.vlgmr.msra.gmra.mxu0 %v808_v22  ;;  %3306 = vmatprep.subr.mxu0 %v5021_v50  ;;  %v4752_v52 = vpop.permute.xlu0 %3699  ;;  %v1509_v22 = vadd.f32 %v3087_v0, %v4490_v36  ;;  %v3547_v36 = vunpack.i.h.bf16 %v4566_v53  ;;  %v3572_v53 = vunpack.i.h.bf16 %v4597_v55  ;;  %v3602_v55 = vunpack.i.h.bf16 %v4641_v19 }
 0x204   :  { %3314 = vmatprep.mubr.msk.f32.mxu0 %vm3914_vm2, %v5021_v50  ;;  %3307 = vmatpush3.msra.mxu0 %v2035_v30  ;;  %v4754_v7 = vpop.permute.xlu1 %3704  ;;  %v3632_v19 = vunpack.i.h.bf16 %v4675_v38  ;;  %v3662_v38 = vunpack.i.h.bf16 %v4705_v15  ;;  %v3682_v15 = vunpack.i.h.bf16 %v4741_v9 }
 0x205   :  { %3308 = vmatprep.subr.mxu0 %v5021_v50 }
 0x206   :  { %3309 = vmatpush3.msra.mxu0 %v2033_v21 }
 0x207   :  { %3310 = vmatprep.subr.mxu0 %v5021_v50  ;;  %v4756_v20 = vpop.permute.xlu0 %3709 }
 0x208   :  { %3311 = vmatpush3.msra.mxu0 %v2031_v49  ;;  %v4758_v11 = vpop.permute.xlu1 %3714  ;;  %v811_v49 = vmax.f32 %v4564_v45, 0.0  ;;  %v3567_v45 = vunpack.i.h.bf16 %v4594_v62  ;;  %v3597_v62 = vunpack.i.h.bf16 %v4638_v28  ;;  %v3627_v28 = vunpack.i.h.bf16 %v4672_v27 }
 0x209   :  { %3312 = vmatprep.subr.mxu0 %v5021_v50  ;;  %v3657_v27 = vunpack.i.h.bf16 %v4702_v32  ;;  %v3681_v32 = vunpack.i.l.bf16 %v4741_v9  ;;  %v3701_v9 = vunpack.i.l.bf16 %v4752_v52 }
 0x20a   :  { %3313 = vmatpush3.msra.mxu0 %v2029_v44  ;;  %v3532_v44 = vunpack.i.h.bf16 %v4538_v58  ;;  %v3552_v58 = vunpack.i.h.bf16 %v4570_v5 }
 0x20b   :  { %3238 = vmatprep.subr.mxu0 %v3687_v35  ;;  %v4760_v33 = vpop.permute.xlu0 %3719  ;;  %v3537_v35 = vunpack.i.h.bf16 %v4546_v17  ;;  %v3557_v17 = vunpack.i.h.bf16 %v4582_v41  ;;  %v3587_v41 = vunpack.i.h.bf16 %v4626_v4  ;;  %v3617_v4 = vunpack.i.h.bf16 %v4659_v3 }
 0x20c   :  { %v4762_v37 = vpop.permute.xlu1 %3724  ;;  %v3647_v3 = vunpack.i.h.bf16 %v4692_v56 }
 0x20f   :  { %v4765_v48 = vpop.permute.xlu0 %3729 }
 0x210   :  { %v4772_v1 = vpop.permute.xlu1 %3734 }
 0x283   :  { %v4746_v63 = vpop.f32.mrf.mxu0 }
 0x285   :  { %v3294_v24 = vpop.f32.mrf.mxu0 }
 0x2a3   :  { %v3120_v39 = vpop.f32.mrf.mxu0 }
 0x2a5   :  { %v3121_v42 = vpop.f32.mrf.mxu0 }
 0x2a6   :  { %v3122_v30 = vadd.f32 %v3121_v42, %v3120_v39  ;;  %v4776_v39 = vpop.permute.xlu0 %3739  ;;  %v4783_v42 = vpop.permute.xlu1 %3744 }
 0x2a8   :  { %v1579_v21 = vadd.f32 %v3122_v30, %v1509_v22  ;;  %v3577_v22 = vunpack.i.h.bf16 %v4610_v51  ;;  %v3582_v30 = vunpack.i.h.bf16 %v4613_v54  ;;  %v3607_v51 = vunpack.i.h.bf16 %v4648_v6 }
 0x2a9   :  { %v3612_v54 = vunpack.i.h.bf16 %v4651_v59  ;;  %v3637_v6 = vunpack.i.h.bf16 %v4682_v43  ;;  %v3642_v59 = vunpack.i.h.bf16 %v4685_v46  ;;  %v3676_v46 = vunpack.i.l.bf16 %v4726_v47 }
 0x2aa   :  { %3304 = vmatmul.mubr.msk.f32.vlgmr.msra.gmra.mxu1 %vm1095_vm3, %v1579_v21  ;;  %v1582_v24 = vmul.f32 %v1579_v21, %v1579_v21  ;;  %v4786_v5 = vpop.permute.xlu0 %3749  ;;  %v4793_v21 = vpop.permute.xlu1 %3754  ;;  %v3696_v47 = vunpack.i.l.bf16 %v4750_v18 }
 0x2ab   :  { %3164 = vmatpush3.msra.mxu1 %v3532_v44  ;;  %2018 = vmatprep.mubr.f32.mxu1 %v811_v49 }
 0x2ac   :  { %3165 = vmatprep.subr.mxu1 %v3537_v35  ;;  %v1583_v0 = vsel %vm1095_vm3, %v1582_v24, 0.0  ;;  %v3672_v24 = vunpack.i.h.bf16 %v4715_v8  ;;  %v810_v8 = vmax.f32 %v4556_v31, 0.0  ;;  %v3706_v31 = vunpack.i.l.bf16 %v4754_v7 }
 0x2ad   :  { %3166 = vmatpush3.msra.mxu1 %v3542_v25  ;;  %1584 = vadd.xlane.f32.xlu1 %v1583_v0  ;;  %v3667_v25 = vunpack.i.h.bf16 %v4712_v12  ;;  %v813_v12 = vmax.f32 %v4578_v23, 0.0  ;;  %v3691_v0 = vunpack.i.l.bf16 %v4748_v61  ;;  %v3711_v23 = vunpack.i.l.bf16 %v4756_v20 }
 0x2ae   :  { %3167 = vmatprep.subr.mxu1 %v3547_v36  ;;  %v4796_v49 = vpop.permute.xlu0 %3759  ;;  %v4803_v44 = vpop.permute.xlu1 %3764  ;;  %v3686_v36 = vunpack.i.l.bf16 %v4743_v16  ;;  %v3716_v16 = vunpack.i.l.bf16 %v4758_v11 }
 0x2af   :  { %3168 = vmatpush3.msra.mxu1 %v3552_v58 }
 0x2b0   :  { %3169 = vmatprep.subr.mxu1 %v3557_v17 }
 0x2b1   :  { %3170 = vmatpush3.msra.mxu1 %v3562_v26  ;;  %v3721_v26 = vunpack.i.l.bf16 %v4760_v33 }
 0x2b2   :  { %3171 = vmatprep.subr.mxu1 %v3567_v45  ;;  %v4806_v35 = vpop.permute.xlu0 %3769  ;;  %v4814_v43 = vpop.permute.xlu1 %3774 }
 0x2b3   :  { %3172 = vmatpush3.msra.mxu1 %v3572_v53  ;;  %v3726_v53 = vunpack.i.l.bf16 %v4762_v37 }
 0x2b4   :  { %3173 = vmatprep.subr.mxu1 %v3577_v22 }
 0x2b5   :  { %3174 = vmatpush3.msra.mxu1 %v3582_v30  ;;  %v3731_v30 = vunpack.i.l.bf16 %v4765_v48 }
 0x2b6   :  { %3175 = vmatprep.subr.mxu1 %v3587_v41  ;;  %v4818_v56 = vpop.permute.xlu0 %3779  ;;  %v4827_v58 = vpop.permute.xlu1 %3784  ;;  %v3736_v41 = vunpack.i.l.bf16 %v4772_v1 }
 0x2b7   :  { %3176 = vmatpush3.msra.mxu1 %v3592_v40  ;;  %v3741_v40 = vunpack.i.l.bf16 %v4776_v39 }
 0x2b8   :  { %3177 = vmatprep.subr.mxu1 %v3597_v62  ;;  %v3746_v62 = vunpack.i.l.bf16 %v4783_v42 }
 0x2b9   :  { %3178 = vmatpush3.msra.mxu1 %v3602_v55  ;;  %v3751_v55 = vunpack.i.l.bf16 %v4786_v5 }
 0x2ba   :  { %3179 = vmatprep.subr.mxu1 %v3607_v51  ;;  %v4830_v17 = vpop.permute.xlu0 %3789  ;;  %v4837_v45 = vpop.permute.xlu1 %3794 }
 0x2bb   :  { %3180 = vmatpush3.msra.mxu1 %v3612_v54  ;;  %v3756_v54 = vunpack.i.l.bf16 %v4793_v21 }
 0x2bc   :  { %3181 = vmatprep.subr.mxu1 %v3617_v4 }
 0x2bd   :  { %3182 = vmatpush3.msra.mxu1 %v3622_v10  ;;  %v3761_v10 = vunpack.i.l.bf16 %v4796_v49 }
 0x2be   :  { %3183 = vmatprep.subr.mxu1 %v3627_v28  ;;  %v4840_v22 = vpop.permute.xlu0 %3799  ;;  %v4847_v51 = vpop.permute.xlu1 %3804  ;;  %v3766_v28 = vunpack.i.l.bf16 %v4803_v44 }
 0x2bf   :  { %3184 = vmatpush3.msra.mxu1 %v3632_v19  ;;  %v3771_v19 = vunpack.i.l.bf16 %v4806_v35 }
 0x2c0   :  { %3185 = vmatprep.subr.mxu1 %v3637_v6  ;;  %v3776_v6 = vunpack.i.l.bf16 %v4814_v43 }
 0x2c1   :  { %3186 = vmatpush3.msra.mxu1 %v3642_v59  ;;  %v3781_v59 = vunpack.i.l.bf16 %v4818_v56 }
 0x2c2   :  { %3187 = vmatprep.subr.mxu1 %v3647_v3  ;;  %v4850_v4 = vpop.permute.xlu0 %3809  ;;  %v4857_v3 = vpop.permute.xlu1 %3814 }
 0x2c3   :  { %3188 = vmatpush3.msra.mxu1 %v3652_v57  ;;  %v3786_v57 = vunpack.i.l.bf16 %v4827_v58 }
 0x2c4   :  { %3189 = vmatprep.subr.mxu1 %v3657_v27 }
 0x2c5   :  { %3190 = vmatpush3.msra.mxu1 %v3662_v38  ;;  %v3791_v38 = vunpack.i.l.bf16 %v4830_v17 }
 0x2c6   :  { %3191 = vmatprep.subr.mxu1 %v3667_v25  ;;  %v4860_v27 = vpop.permute.xlu0 %3819  ;;  %v3801_v25 = vunpack.i.l.bf16 %v4840_v22 }
 0x2c7   :  { %3192 = vmatpush3.msra.mxu1 %v3672_v24  ;;  %v3796_v24 = vunpack.i.l.bf16 %v4837_v45 }
 0x2c8   :  { %3193 = vmatprep.subr.mxu1 %v3676_v46  ;;  %v3806_v46 = vunpack.i.l.bf16 %v4847_v51 }
 0x2c9   :  { %3194 = vmatpush3.msra.mxu1 %v3677_v34  ;;  %v3811_v34 = vunpack.i.l.bf16 %v4850_v4 }
 0x2ca   :  { %2019 = vmatmul.mubr.f32.vlgmr.msra.gmra.mxu1 %v810_v8  ;;  %3203 = vmatprep.subr.mxu1 %v3681_v32  ;;  %v4867_v32 = vpop.permute.xlu1 %3824  ;;  %v4870_v8 = vpop.permute.xlu0 %3829 }
 0x2cb   :  { %3204 = vmatpush3.msra.mxu1 %v3682_v15  ;;  %2386 = vmatprep.mubr.f32.mxu1 %v813_v12  ;;  %v3816_v15 = vunpack.i.l.bf16 %v4857_v3  ;;  %v3826_v12 = vunpack.i.l.bf16 %v4867_v32 }
 0x2cc   :  { %3205 = vmatprep.subr.mxu1 %v3686_v36  ;;  %v3821_v36 = vunpack.i.l.bf16 %v4860_v27 }
 0x2cd   :  { %3206 = vmatpush3.msra.mxu1 %v3691_v0  ;;  %v3831_v0 = vunpack.i.l.bf16 %v4870_v8 }
 0x2ce   :  { %3207 = vmatprep.subr.mxu1 %v3696_v47  ;;  %v812_v47 = vmax.f32 %v4568_v60, 0.0 }
 0x2cf   :  { %3208 = vmatpush3.msra.mxu1 %v3701_v9  ;;  %v4879_v9 = vpop.permute.xlu1 %3834 }
 0x2d0   :  { %3209 = vmatprep.subr.mxu1 %v3706_v31 }
 0x2d1   :  { %3210 = vmatpush3.msra.mxu1 %v3711_v23  ;;  %v2473_v23 = vpop.permute.xlu0 %2472 }
 0x2d2   :  { %3211 = vmatprep.subr.mxu1 %v3716_v16 }
 0x2d3   :  { %3212 = vmatpush3.msra.mxu1 %v3721_v26  ;;  %v2471_v31 = vpop.permute.xlu1 %2470 }
 0x2d4   :  { %3213 = vmatprep.subr.mxu1 %v3726_v53 }
 0x2d5   :  { %3214 = vmatpush3.msra.mxu1 %v3731_v30  ;;  %v4884_v60 = vpop.permute.xlu0 %2319 }
 0x2d6   :  { %3215 = vmatprep.subr.mxu1 %v3736_v41 }
 0x2d7   :  { %3216 = vmatpush3.msra.mxu1 %v3741_v40  ;;  %v2469_v16 = vpop.permute.xlu1 %2468  ;;  %v3160_v40 = vpop.f32.mrf.mxu0 }
 0x2d8   :  { %3217 = vmatprep.subr.mxu1 %v3746_v62 }
 0x2d9   :  { %3218 = vmatpush3.msra.mxu1 %v3751_v55  ;;  %v2467_v26 = vpop.permute.xlu0 %2466  ;;  %v3161_v62 = vpop.f32.mrf.mxu0 }
 0x2da   :  { %3219 = vmatprep.subr.mxu1 %v3756_v54  ;;  %v3162_v55 = vadd.f32 %v3161_v62, %v3160_v40 }
 0x2db   :  { %3220 = vmatpush3.msra.mxu1 %v3761_v10 }
 0x2dc   :  { %3221 = vmatprep.subr.mxu1 %v3766_v28  ;;  %v1951_v28 = vadd.f32 %v3162_v55, %v4738_v14 }
 0x2dd   :  { %3222 = vmatpush3.msra.mxu1 %v3771_v19 }
 0x2de   :  { %3223 = vmatprep.subr.mxu1 %v3776_v6 }
 0x2df   :  { %3224 = vmatpush3.msra.mxu1 %v3781_v59  ;;  %v815_v59 = vmax.f32 %v4580_v29, 0.0  ;;  %v3717_v29 = vunpack.i.h.bf16 %v4758_v11  ;;  %v3752_v11 = vunpack.i.h.bf16 %v4786_v5  ;;  %v3787_v5 = vunpack.i.h.bf16 %v4827_v58 }
 0x2e0   :  { %3225 = vmatprep.subr.mxu1 %v3786_v57  ;;  %v3692_v57 = vunpack.i.h.bf16 %v4748_v61  ;;  %v3722_v61 = vunpack.i.h.bf16 %v4760_v33  ;;  %v3757_v33 = vunpack.i.h.bf16 %v4793_v21  ;;  %v3792_v21 = vunpack.i.h.bf16 %v4830_v17 }
 0x2e1   :  { %3226 = vmatpush3.msra.mxu1 %v3791_v38  ;;  %v3697_v38 = vunpack.i.h.bf16 %v4750_v18  ;;  %v3727_v18 = vunpack.i.h.bf16 %v4762_v37  ;;  %v3762_v37 = vunpack.i.h.bf16 %v4796_v49  ;;  %v3797_v49 = vunpack.i.h.bf16 %v4837_v45 }
 0x2e2   :  { %3227 = vmatprep.subr.mxu1 %v3796_v24  ;;  %v3822_v58 = vunpack.i.h.bf16 %v4860_v27  ;;  %v3832_v17 = vunpack.i.h.bf16 %v4870_v8  ;;  %v3827_v45 = vunpack.i.h.bf16 %v4867_v32 }
 0x2e3   :  { %3228 = vmatpush3.msra.mxu1 %v3801_v25  ;;  %v3702_v25 = vunpack.i.h.bf16 %v4752_v52  ;;  %v3732_v52 = vunpack.i.h.bf16 %v4765_v48  ;;  %v3767_v48 = vunpack.i.h.bf16 %v4803_v44  ;;  %v3802_v44 = vunpack.i.h.bf16 %v4840_v22 }
 0x2e4   :  { %3229 = vmatprep.subr.mxu1 %v3806_v46  ;;  %v3707_v46 = vunpack.i.h.bf16 %v4754_v7  ;;  %v3737_v7 = vunpack.i.h.bf16 %v4772_v1  ;;  %v3772_v1 = vunpack.i.h.bf16 %v4806_v35  ;;  %v3807_v35 = vunpack.i.h.bf16 %v4847_v51 }
 0x2e5   :  { %3230 = vmatpush3.msra.mxu1 %v3811_v34  ;;  %v3712_v34 = vunpack.i.h.bf16 %v4756_v20  ;;  %v3747_v20 = vunpack.i.h.bf16 %v4783_v42  ;;  %v3782_v42 = vunpack.i.h.bf16 %v4818_v56  ;;  %v3817_v56 = vunpack.i.h.bf16 %v4857_v3 }
 0x2e6   :  { %3231 = vmatprep.subr.mxu1 %v3816_v15  ;;  %v3742_v15 = vunpack.i.h.bf16 %v4776_v39  ;;  %v3777_v39 = vunpack.i.h.bf16 %v4814_v43  ;;  %v3812_v43 = vunpack.i.h.bf16 %v4850_v4  ;;  %v3837_v22 = vunpack.i.h.bf16 %v4879_v9 }
 0x2e7   :  { %3232 = vmatpush3.msra.mxu1 %v3821_v36  ;;  %v3836_v36 = vunpack.i.l.bf16 %v4879_v9  ;;  %v814_v51 = vmax.f32 %v4572_v13, 0.0 }
 0x2e8   :  { %3233 = vmatprep.subr.mxu1 %v3826_v12 }
 0x2e9   :  { %3234 = vmatpush3.msra.mxu1 %v3831_v0 }
 0x2ea   :  { %2387 = vmatmul.mubr.f32.vlgmr.msra.gmra.mxu1 %v812_v47  ;;  %3317 = vmatprep.subr.mxu1 %v5021_v50 }
 0x2eb   :  { %3325 = vmatprep.mubr.msk.f32.mxu1 %vm3914_vm2, %v5021_v50  ;;  %3318 = vmatpush3.msra.mxu1 %v2473_v23 }
 0x2ec   :  { %3319 = vmatprep.subr.mxu1 %v5021_v50 }
 0x2ed   :  { %3320 = vmatpush3.msra.mxu1 %v2471_v31 }
 0x2ee   :  { %3321 = vmatprep.subr.mxu1 %v5021_v50 }
 0x2ef   :  { %3322 = vmatpush3.msra.mxu1 %v2469_v16 }
 0x2f0   :  { %3323 = vmatprep.subr.mxu1 %v5021_v50 }
 0x2f1   :  { %3324 = vmatpush3.msra.mxu1 %v2467_v26  ;;  %v4931_v26 = vld [vmem:[#allocation6 + $0x1] ss:$0 sm:$0xff] }
 0x2f2   :  { %3335 = vmatprep.subr.mxu1 %v5021_v50 }
 0x336   :  { %v1585_v16 = vpop.xlane.xlu1 %1584 }
 0x36a   :  { %v1671_v53 = vpop.f32.mrf.mxu1 }
 0x36b   :  { %v1676_v30 = vmul.f32 2.0, %v1671_v53 }
 0x36c   :  { %v3305_v41 = vpop.f32.mrf.mxu1 }
 0x36d   :  { %1678 = vrot.lane.b32.xlu1 %v1676_v30, %s3917_s12  ;;  %v1675_v41 = vadd.f32 %v4931_v26, %v1585_v16 }
 0x38a   :  { %v3195_v54 = vpop.f32.mrf.mxu1 }
 0x38c   :  { %v3196_v10 = vpop.f32.mrf.mxu1 }
 0x38d   :  { %v3197_v19 = vadd.f32 %v3196_v10, %v3195_v54 }
 0x38f   :  { %v2021_v6 = vadd.f32 %v3197_v19, %v1951_v28 }
 0x391   :  { %3315 = vmatmul.mubr.msk.f32.vlgmr.msra.gmra.mxu0 %vm1095_vm3, %v2021_v6  ;;  %v2024_v24 = vmul.f32 %v2021_v6, %v2021_v6 }
 0x392   :  { %3239 = vmatpush3.msra.mxu0 %v3692_v57  ;;  %2456 = vmatprep.mubr.f32.mxu0 %v815_v59  ;;  %v1094_v59 = vmul.f32 %v4599_v2, %v4599_v2 }
 0x393   :  { %3240 = vmatprep.subr.mxu0 %v3697_v38  ;;  %v2025_v14 = vsel %vm1095_vm3, %v2024_v24, 0.0 }
 0x394   :  { %3241 = vmatpush3.msra.mxu0 %v3702_v25  ;;  %2026 = vadd.xlane.f32.xlu0 %v2025_v14  ;;  %v1096_v57 = vsel %vm1095_vm3, %v1094_v59, 0.0  ;;  %v1177_v14 = vmul.f32 2.0, %v4746_v63 }
 0x395   :  { %3242 = vmatprep.subr.mxu0 %v3707_v46 }
 0x396   :  { %3243 = vmatpush3.msra.mxu0 %v3712_v34 }
 0x397   :  { %3244 = vmatprep.subr.mxu0 %v3717_v29 }
 0x398   :  { %3245 = vmatpush3.msra.mxu0 %v3722_v61 }
 0x399   :  { %3246 = vmatprep.subr.mxu0 %v3727_v18 }
 0x39a   :  { %3247 = vmatpush3.msra.mxu0 %v3732_v52 }
 0x39b   :  { %3248 = vmatprep.subr.mxu0 %v3737_v7 }
 0x39c   :  { %3249 = vmatpush3.msra.mxu0 %v3742_v15 }
 0x39d   :  { %3250 = vmatprep.subr.mxu0 %v3747_v20 }
 0x39e   :  { %3251 = vmatpush3.msra.mxu0 %v3752_v11  ;;  %v2566_v11 = vlaneseq }
 0x39f   :  { %3252 = vmatprep.subr.mxu0 %v3757_v33 }
 0x3a0   :  { %3253 = vmatpush3.msra.mxu0 %v3762_v37  ;;  %v2567_v33 = vand.u32 127, %v2566_v11 }
 0x3a1   :  { %3254 = vmatprep.subr.mxu0 %v3767_v48 }
 0x3a2   :  { %3255 = vmatpush3.msra.mxu0 %v3772_v1 }
 0x3a3   :  { %3256 = vmatprep.subr.mxu0 %v3777_v39 }
 0x3a4   :  { %3257 = vmatpush3.msra.mxu0 %v3782_v42 }
 0x3a5   :  { %3258 = vmatprep.subr.mxu0 %v3787_v5  ;;  %v2592_v5 = vld [vmem:[#allocation6 + $0x30] sm:$0xff] }
 0x3a6   :  { %3259 = vmatpush3.msra.mxu0 %v3792_v21  ;;  %v2591_v21 = vld [vmem:[#allocation6 + $0x28] sm:$0xff] }
 0x3a7   :  { %3260 = vmatprep.subr.mxu0 %v3797_v49  ;;  %v3838_v49 = vld [vmem:[%s4985_s0] sm:$0xff] }
 0x3a8   :  { %3261 = vmatpush3.msra.mxu0 %v3802_v44 }
 0x3a9   :  { %3262 = vmatprep.subr.mxu0 %v3807_v35 }
 0x3aa   :  { %3263 = vmatpush3.msra.mxu0 %v3812_v43  ;;  %v3235_v27 = vpop.f32.mrf.mxu1 }
 0x3ab   :  { %3264 = vmatprep.subr.mxu0 %v3817_v56 }
 0x3ac   :  { %3265 = vmatpush3.msra.mxu0 %v3822_v58  ;;  %v3236_v32 = vpop.f32.mrf.mxu1  ;;  %v2674_v58 = vmul.f32 %v3838_v49, %v3838_v49 }
 0x3ad   :  { %3266 = vmatprep.subr.mxu0 %v3827_v45  ;;  %v3237_v8 = vadd.f32 %v3236_v32, %v3235_v27 }
 0x3ae   :  { %3267 = vmatpush3.msra.mxu0 %v3832_v17  ;;  %v2675_v17 = vsel %vm1095_vm3, %v2674_v58, 0.0 }
 0x3af   :  { %3268 = vmatprep.subr.mxu0 %v3836_v36  ;;  %v2389_v47 = vadd.f32 %v3237_v8, %v4884_v60 }
 0x3b0   :  { %3269 = vmatpush3.msra.mxu0 %v3837_v22 }
 0x3b1   :  { %2457 = vmatmul.mubr.f32.vlgmr.msra.gmra.mxu0 %v814_v51  ;;  %3328 = vmatprep.subr.mxu0 %v5021_v50 }
 0x3b2   :  { %3332 = vmatprep.mubr.msk.f32.mxu0 %vm3914_vm2, %v5021_v50  ;;  %3329 = vmatpush3.msra.mxu0 %v2592_v5 }
 0x3b3   :  { %3330 = vmatprep.subr.mxu0 %v5021_v50 }
 0x3b4   :  { %3331 = vmatpush3.msra.mxu0 %v2591_v21 }
 0x3df   :  { %v1679_v30 = vpop.permute.xlu1 %1678 }
 0x3e0   :  { %v1681_v60 = vsub.f32 %v1675_v41, %v1679_v30 }
 0x41d   :  { %v2027_v40 = vpop.xlane.xlu0 %2026 }
 0x41e   :  { %v2113_v55 = vadd.f32 %v4931_v26, %v2027_v40 }
 0x451   :  { %v2109_v4 = vpop.f32.mrf.mxu0 }
 0x452   :  { %v2114_v53 = vmul.f32 2.0, %v2109_v4 }
 0x453   :  { %v3316_v3 = vpop.f32.mrf.mxu0 }
 0x471   :  { %v3270_v12 = vpop.f32.mrf.mxu0 }
 0x473   :  { %v3271_v0 = vpop.f32.mrf.mxu0 }
 0x474   :  { %v3272_v9 = vadd.f32 %v3271_v0, %v3270_v12 }
 0x476   :  { %v2459_v31 = vadd.f32 %v3272_v9, %v2389_v47 }
 0x478   :  { %3326 = vmatmul.mubr.msk.f32.vlgmr.msra.gmra.mxu1 %vm1095_vm3, %v2459_v31  ;;  %v2462_v13 = vmul.f32 %v2459_v31, %v2459_v31 }
 0x479   :  { %3339 = vmatprep.mubr.msk.f32.mxu1 %vm3914_vm2, %v5021_v50  ;;  %3336 = vmatpush3.xpose.msk.msra.mxu1 %vm1095_vm3, %v2592_v5 }
 0x47a   :  { %v2463_v23 = vsel %vm1095_vm3, %v2462_v13, 0.0  ;;  %3337 = vmatprep.subr.mxu1 %v5021_v50 }
 0x47b   :  { %2464 = vadd.xlane.f32.xlu0 %v2463_v23 }
 0x47d   :  { %3338 = vmatpush3.xpose.msk.msra.mxu1 %vm1095_vm3, %v2591_v21 }
 0x480   :  { %3340 = vmatmul.mubr.msk.f32.vlgmr.msra.gmra.mxu1 %vm1095_vm3, %v3838_v49 }
 0x491   :  { %2116 = vrot.lane.b32.xlu0 %v2114_v53, %s3915_s10 }
 0x495   :  { %1685 = vrot.lane.b32.xlu0 %v1681_v60, %s3913_s9 }
 0x504   :  { %v2465_v62 = vpop.xlane.xlu0 %2464 }
 0x505   :  { %v2551_v38 = vadd.f32 %v4931_v26, %v2465_v62 }
 0x508   :  { %v2117_v54 = vpop.permute.xlu0 %2116 }
 0x509   :  { %v2119_v10 = vsub.f32 %v2113_v55, %v2117_v54 }
 0x50b   :  { %2123 = vrot.lane.b32.xlu0 %v2119_v10, %s3912_s8 }
 0x50c   :  { %v1686_v2 = vpop.permute.xlu0 %1685 }
 0x538   :  { %v2547_v28 = vpop.f32.mrf.mxu1 }
 0x539   :  { %v2552_v19 = vmul.f32 2.0, %v2547_v28 }
 0x53a   :  { %v3327_v6 = vpop.f32.mrf.mxu1 }
 0x53b   :  { %2554 = vrot.lane.b32.xlu1 %v2552_v19, %s3918_s13 }
 0x540   :  { %v2752_v45 = vpop.f32.mrf.mxu1 }
 0x541   :  { %v2762_v36 = vmul.f32 2.0, %v2752_v45 }
 0x542   :  { %v3341_v22 = vpop.f32.mrf.mxu1 }
 0x55f   :  { %1097 = vadd.xlane.f32.xlu1 %v1096_v57 }
 0x57d   :  { %v2124_v61 = vpop.permute.xlu0 %2123 }
 0x5ad   :  { %v2555_v24 = vpop.permute.xlu1 %2554 }
 0x5ae   :  { %v2557_v25 = vsub.f32 %v2551_v38, %v2555_v24 }
 0x5b0   :  { %2561 = vrot.lane.b32.xlu0 %v2557_v25, %s3916_s11 }
 0x5e8   :  { %v1098_v46 = vpop.xlane.xlu1 %1097 }
 0x5e9   :  { %v1176_v34 = vadd.f32 %v4931_v26, %v1098_v46 }
 0x5eb   :  { %v1178_v29 = vsub.f32 %v1176_v34, %v1177_v14 }
 0x5ed   :  { %1180 = vst.msk [vmem:[%s4989_s4] sm:$0xff] %vm1179_vm4, %v1178_v29  ;;  %v1688_v63 = vadd.f32 %v1686_v2, %v1178_v29 }
 0x5ee   :  { %1683 = vst.msk [vmem:[%s4989_s4] sm:$0xff] %vm1682_vm5, %v1681_v60 }
 0x5ef   :  { %2121 = vst.msk [vmem:[%s4989_s4] sm:$0xff] %vm2120_vm6, %v2119_v10  ;;  %v2126_v18 = vadd.f32 %v2124_v61, %v1688_v63 }
 0x5f0   :  { %2559 = vst.msk [vmem:[%s4989_s4] sm:$0xff] %vm2558_vm7, %v2557_v25 }
 0x622   :  { %v2562_v52 = vpop.permute.xlu0 %2561 }
 0x623   :  { %v2564_v7 = vadd.f32 %v2562_v52, %v2126_v18 }
 0x625   :  { %v2565_v15 = vmul.f32 0.25, %v2564_v7 }
 0x627   :  { %v2568_v20 = vsel %vm1179_vm4, %v2565_v15, inf }
 0x628   :  { %2569 = vmin.xlane.f32.xlu0 %v2568_v20 }
 0x63e   :  { %2764 = vrot.lane.b32.xlu0 %v2762_v36, %s3904_s18 }
 0x6b1   :  { %v2570_v37 = vpop.xlane.xlu0 %2569 }
 0x6b2   :  { %vm2571_vm8 = vcmp.eq.f32.partialorder %v2565_v15, %v2570_v37 }
 0x6b3   :  { %v2572_v48 = vsel %vm2571_vm8, %v2567_v33, 16 }
 0x6b4   :  { %v2573_v1 = vsel %vm1179_vm4, %v2572_v48, 2147483647 }
 0x6b5   :  { %v2575_v39 = vshra.s32 %v2573_v1, 16  ;;  %v2574_v44 = vand.u32 65535, %v2573_v1  ;;  %v2765_v47 = vpop.permute.xlu0 %2764 }
 0x6b7   :  { %v2577_v42 = vcvt.s32.f32 %v2575_v39  ;;  %v2576_v43 = vcvt.s32.f32 %v2574_v44 }
 0x6b9   :  { %2578 = vmin.xlane.f32.xlu1 %v2577_v42 }
 0x742   :  { %v2579_v35 = vpop.xlane.xlu1 %2578 }
 0x743   :  { %vm2580_vm9 = vcmp.eq.f32.partialorder %v2577_v42, %v2579_v35  ;;  %v2585_v51 = vcvt.f32.s32 %v2579_v35 }
 0x744   :  { %v2581_v56 = vsel %vm2580_vm9, %v2576_v43, inf }
 0x745   :  { %2582 = vmin.xlane.f32.xlu1 %v2581_v56  ;;  %v2586_v3 = vshll.u32 %v2585_v51, 16 }
 0x749   :  { %2676 = vadd.xlane.f32.xlu1 %v2675_v17 }
 0x7ce   :  { %v2583_v4 = vpop.xlane.xlu1 %2582 }
 0x7cf   :  { %v2584_v27 = vcvt.f32.s32 %v2583_v4 }
 0x7d1   :  { %v2587_v32 = vadd.s32 %v2586_v3, %v2584_v27 }
 0x7d2   :  { %v2677_v12 = vpop.xlane.xlu1 %2676 }
 0x7d3   :  { %vm2588_vm10 = vcmp.eq.s32.totalorder %v2567_v33, %v2587_v32  ;;  %v2761_v0 = vadd.f32 %v4931_v26, %v2677_v12 }
 0x7d4   :  { %v2813_v8 = vsel %vm2588_vm10, 1.0, %v5021_v50 }
 0x7d5   :  { %3333 = vmatmul.mubr.msk.f32.vlgmr.msra.gmra.mxu0 %vm1179_vm4, %v2813_v8  ;;  %v2767_v13 = vsub.f32 %v2761_v0, %v2765_v47 }
 0x7d7   :  { %v2768_v53 = vmul.f32 1.25, %v2767_v13 }
 0x895   :  { %v2662_v9 = vpop.f32.mrf.mxu0 }
 0x896   :  { %v2666_v31 = vsub.f32 %v2662_v9, %v3838_v49 }
 0x897   :  { %v3334_v23 = vpop.f32.mrf.mxu0 }
 0x898   :  { %v2667_v16 = vadd.f32 %v3838_v49, %v2666_v31 }
 0x89a   :  { %2669 = vrot.lane.b32.xlu1 %v2667_v16, %s3904_s18 }
 0x89e   :  { %2770 = vrot.lane.b32.xlu1 %v2768_v53, %s3915_s10 }
 0x90c   :  { %v2670_v30 = vpop.permute.xlu1 %2669 }
 0x90d   :  { %2673 = vst.msk [vmem:[%s4989_s4] sm:$0xff] %vm2672_vm11, %v2670_v30 }
 0x910   :  { %v2771_v26 = vpop.permute.xlu1 %2770 }
 0x911   :  { %2774 = vst.msk [vmem:[%s4989_s4] sm:$0xff] %vm2773_vm12, %v2771_v26 }
 0x912   :  { %2776 = vst.msk [vmem:[%s4989_s4] sm:$0xff] %vm2775_vm13, %v5021_v50 }
 0x913   :  { %2781 = vsyncpa [#allocation3], 1 }
 0x914   :  { %2782 = vsyncpa [#allocation5], 1 }

</bundles_post_ra>
